<compile_context>
chip_gen: v7x
topology: tpu7x:2x2x1
jax: 0.10.0
libtpu: 0.0.40
codegen_flags: <defaults>
</compile_context>

<pallas_src>
import functools

import numpy as np
import jax
import jax.numpy as jnp
from jax.experimental import pallas as pl
from jax.experimental.pallas import tpu as pltpu


def _ceil8(c):
    return max(8, ((c + 7) // 8) * 8)


# ----------------------------------------------------------------------------
# In-kernel helpers
# ----------------------------------------------------------------------------

def _conv3x3_packed(x, w, b, masks, W, L):
    """3x3 SAME conv on a channel-padded, batch-packed activation.

    x     : (CP, L) f32 — L = Bn*H*W lanes, channels (padded to CP) on sublanes.
    w     : (CO, 9*CP) f32 padded weights; column t*CP+ci for tap t = ky*3 + kx.
    b     : (CO, 1) f32 padded bias.
    masks : list of 9 (CP, L) {0,1} validity masks — zero wherever the rolled read leaves the
            source image (this also covers cross-image wrap in the packed layout).
    """
    rows = []
    for t in range(9):
        ky, kx = divmod(t, 3)
        off = (ky - 1) * W + (kx - 1)          # flat in-image offset read by this tap
        if off == 0:
            rows.append(x)                      # centre tap: no shift, always valid
        else:
            # XLU lane rotate (jnp.roll semantics): rolled[:, i] = x[:, (i + off) % L].
            rolled = pltpu.roll(x, shift=(-off) % L, axis=1)
            rows.append(rolled * masks[t])
    slab = jnp.concatenate(rows, axis=0)        # (9*CP, L): every tap block 8-sublane aligned
    return jnp.dot(w, slab, preferred_element_type=jnp.float32) + b


# ----------------------------------------------------------------------------
# Fused Pallas kernels
# ----------------------------------------------------------------------------

def _irn_fwd_kernel(mask_ref, x1_ref, x2_ref, wF_ref, bF_ref, wHG_ref, bHG_ref,
                    y1_ref, y2_ref, *, W, CP, n_blocks):
    """All InvBlocks (forward direction) fused: intermediates never leave VMEM/vregs."""
    L = x1_ref.shape[-1]
    masks = [mask_ref[t * CP:(t + 1) * CP, :] for t in range(9)]    # hoisted once
    x1 = x1_ref[...]                           # (CP, L), rows >= c_ho are zero
    x2 = x2_ref[...]                           # (CP, L), rows >= c_hi are zero
    # TODO(synk): for large block_num switch to lax.fori_loop (dynamic wF_ref[blk] indexing)
    # to bound vreg live ranges; 2 blocks unroll fine.
    for blk in range(n_blocks):
        t2 = _conv3x3_packed(x2, wF_ref[blk], bF_ref[blk], masks, W, L)      # F(x2)
        y1 = x1 + t2
        st = _conv3x3_packed(y1, wHG_ref[blk], bHG_ref[blk], masks, W, L)    # [H(y1); G(y1)]
        s1 = st[:CP, :]
        t1 = st[CP:, :]
        e = jnp.exp(2.0 * (jax.nn.sigmoid(s1) - 0.5))                        # clamp = 1.0
        x1, x2 = y1, e * x2 + t1
    y1_ref[...] = x1
    y2_ref[...] = x2


def _pm_irn_rev_kernel(mask_ref, x_ref, wi_ref, bi_ref, w1_ref, b1_ref, w2_ref, b2_ref,
                       wF_ref, bF_ref, wHG_ref, bHG_ref,
                       y1_ref, y2_ref, z_ref, *, W, CP, n_blocks, n_rbm):
    """PredictiveModuleMIMO + all reverse InvBlocks fused in one kernel."""
    L = x_ref.shape[-1]
    masks = [mask_ref[t * CP:(t + 1) * CP, :] for t in range(9)]
    x1 = x_ref[...]
    # ---- PredictiveModuleMIMO: conv_in + ResidualBlockNoBN stack ----
    h = _conv3x3_packed(x1, wi_ref[...], bi_ref[...], masks, W, L)
    for blk in range(n_rbm):
        t = _conv3x3_packed(h, w1_ref[blk], b1_ref[blk], masks, W, L)
        t = jnp.maximum(t, 0.2 * t)            # LeakyReLU(0.2), MIMO-VRN
        t = _conv3x3_packed(t, w2_ref[blk], b2_ref[blk], masks, W, L)
        h = h + t
    z_ref[...] = h
    # ---- InvNN reverse; out_z consumed directly from vregs/VMEM ----
    x2 = h
    for blk in reversed(range(n_blocks)):
        st = _conv3x3_packed(x1, wHG_ref[blk], bHG_ref[blk], masks, W, L)
        s1 = st[:CP, :]
        t1 = st[CP:, :]
        # multiply by exp(-arg) instead of dividing by exp(arg): stays on the EUP.
        e_inv = jnp.exp(-2.0 * (jax.nn.sigmoid(s1) - 0.5))
        y2 = (x2 - t1) * e_inv
        t2 = _conv3x3_packed(y2, wF_ref[blk], bF_ref[blk], masks, W, L)
        x1, x2 = x1 - t2, y2
    y1_ref[...] = x1
    y2_ref[...] = x2


# ----------------------------------------------------------------------------
# Wrapper plumbing: packing, padding, masks, pallas_call
# ----------------------------------------------------------------------------

def _default_grid_n(N):
    """grid steps == TensorCore count: 2 on v7x (sharded via 'parallel'), else 1."""
    try:
        kind = jax.devices()[0].device_kind.lower()
    except Exception:
        kind = ""
    if N % 2 == 0 and ("v7" in kind or "7x" in kind):
        return 2
    return 1


def _tap_masks_packed(H, W, N, CP):
    """(9*CP, N*H*W) {0,1} masks, tap-major, pre-broadcast over CP sublanes and tiled over N."""
    hh, ww = np.meshgrid(np.arange(H), np.arange(W), indexing="ij")
    rows = []
    for ky in range(3):
        for kx in range(3):
            hv, wv = hh + ky - 1, ww + kx - 1
            valid = ((hv >= 0) & (hv < H) & (wv >= 0) & (wv < W)).reshape(-1)
            rows.append(np.tile(valid, N))
    m = np.stack(rows, axis=0).astype(np.float32)      # (9, N*HW)
    m = np.repeat(m, CP, axis=0)                       # (9*CP, N*HW)
    return jnp.asarray(m)


def _pack(x, CP):
    """(N, C, H, W) -> (CP, N*H*W), channels zero-padded to CP sublanes."""
    N, C, H, W = x.shape
    xp = jnp.transpose(x, (1, 0, 2, 3)).reshape(C, N * H * W)
    if CP > C:
        xp = jnp.pad(xp, ((0, CP - C), (0, 0)))
    return xp


def _unpack(xp, N, C, H, W):
    """(CP, N*H*W) -> (N, C, H, W)."""
    return jnp.transpose(xp[:C].reshape(C, N, H, W), (1, 0, 2, 3))


def _pad_w(w, cin, CP):
    cout = w.shape[0]
    w3 = w.reshape(cout, 9, cin)
    w3 = jnp.pad(w3, ((0, CP - cout), (0, 0), (0, CP - cin)))
    return w3.reshape(CP, 9 * CP)


def _pad_w_stack(w, cin, CP):
    nb, cout, _ = w.shape
    w4 = w.reshape(nb, cout, 9, cin)
    w4 = jnp.pad(w4, ((0, 0), (0, CP - cout), (0, 0), (0, CP - cin)))
    return w4.reshape(nb, CP, 9 * CP)


def _pad_b(b, CP):
    return jnp.pad(b, ((0, CP - b.shape[0]), (0, 0)))


def _pad_b_stack(b, CP):
    return jnp.pad(b, ((0, 0), (0, CP - b.shape[1]), (0, 0)))


def _irn_padded_weights(irn_p, CP):
    c_ho = irn_p["wF"].shape[1]
    c_hi = irn_p["wF"].shape[2] // 9
    wF = _pad_w_stack(irn_p["wF"], c_hi, CP)
    bF = _pad_b_stack(irn_p["bF"], CP)
    # H and G share one matmul: H output rows [0, CP), G output rows [CP, 2*CP).
    wHG = jnp.concatenate([_pad_w_stack(irn_p["wH"], c_ho, CP),
                           _pad_w_stack(irn_p["wG"], c_ho, CP)], axis=1)
    bHG = jnp.concatenate([_pad_b_stack(irn_p["bH"], CP),
                           _pad_b_stack(irn_p["bG"], CP)], axis=1)
    return wF, bF, wHG, bHG


def _irn_fwd_call(irn_p, mask, x1p, x2p, W, CP, grid_n):
    NL = x1p.shape[1]
    BnL = NL // grid_n
    nb = irn_p["wF"].shape[0]
    wF, bF, wHG, bHG = _irn_padded_weights(irn_p, CP)
    kernel = functools.partial(_irn_fwd_kernel, W=W, CP=CP, n_blocks=nb)
    act = lambda g: (0, g)
    rep3 = lambda g: (0, 0, 0)
    return pl.pallas_call(
        kernel,
        out_shape=(jax.ShapeDtypeStruct((CP, NL), jnp.float32),
                   jax.ShapeDtypeStruct((CP, NL), jnp.float32)),
        grid=(grid_n,),
        in_specs=[
            pl.BlockSpec((9 * CP, BnL), act),
            pl.BlockSpec((CP, BnL), act),
            pl.BlockSpec((CP, BnL), act),
            pl.BlockSpec((nb, CP, 9 * CP), rep3),
            pl.BlockSpec((nb, CP, 1), rep3),
            pl.BlockSpec((nb, 2 * CP, 9 * CP), rep3),
            pl.BlockSpec((nb, 2 * CP, 1), rep3),
        ],
        out_specs=(pl.BlockSpec((CP, BnL), act),
                   pl.BlockSpec((CP, BnL), act)),
        compiler_params=pltpu.CompilerParams(dimension_semantics=("parallel",)),
    )(mask, x1p, x2p, wF, bF, wHG, bHG)


def _pm_irn_rev_call(params, mask, xp, W, CP, grid_n):
    NL = xp.shape[1]
    BnL = NL // grid_n
    irn_p, pm_p = params["irn"], params["pm"]
    nb = irn_p["wF"].shape[0]
    nrb = pm_p["w1"].shape[0]
    nf = pm_p["wi"].shape[0]
    c_ho = irn_p["wF"].shape[1]
    wF, bF, wHG, bHG = _irn_padded_weights(irn_p, CP)
    wi = _pad_w(pm_p["wi"], c_ho, CP)
    bi = _pad_b(pm_p["bi"], CP)
    w1 = _pad_w_stack(pm_p["w1"], nf, CP)
    b1 = _pad_b_stack(pm_p["b1"], CP)
    w2 = _pad_w_stack(pm_p["w2"], nf, CP)
    b2 = _pad_b_stack(pm_p["b2"], CP)
    kernel = functools.partial(_pm_irn_rev_kernel, W=W, CP=CP, n_blocks=nb, n_rbm=nrb)
    act = lambda g: (0, g)
    rep2 = lambda g: (0, 0)
    rep3 = lambda g: (0, 0, 0)
    return pl.pallas_call(
        kernel,
        out_shape=(jax.ShapeDtypeStruct((CP, NL), jnp.float32),
                   jax.ShapeDtypeStruct((CP, NL), jnp.float32),
                   jax.ShapeDtypeStruct((CP, NL), jnp.float32)),
        grid=(grid_n,),
        in_specs=[
            pl.BlockSpec((9 * CP, BnL), act),
            pl.BlockSpec((CP, BnL), act),
            pl.BlockSpec((CP, 9 * CP), rep2),
            pl.BlockSpec((CP, 1), rep2),
            pl.BlockSpec((nrb, CP, 9 * CP), rep3),
            pl.BlockSpec((nrb, CP, 1), rep3),
            pl.BlockSpec((nrb, CP, 9 * CP), rep3),
            pl.BlockSpec((nrb, CP, 1), rep3),
            pl.BlockSpec((nb, CP, 9 * CP), rep3),
            pl.BlockSpec((nb, CP, 1), rep3),
            pl.BlockSpec((nb, 2 * CP, 9 * CP), rep3),
            pl.BlockSpec((nb, 2 * CP, 1), rep3),
        ],
        out_specs=(pl.BlockSpec((CP, BnL), act),
                   pl.BlockSpec((CP, BnL), act),
                   pl.BlockSpec((CP, BnL), act)),
        compiler_params=pltpu.CompilerParams(dimension_semantics=("parallel",)),
    )(mask, xp, wi, bi, w1, b1, w2, b2, wF, bF, wHG, bHG)


# ----------------------------------------------------------------------------
# Parameters + VSN forward graph
# ----------------------------------------------------------------------------

def init_vsn_params(key, c_ho, c_hi, nf, block_num, block_num_rbm, scale=0.1):
    def conv_p(k, cin, cout):
        kw, kb = jax.random.split(k)
        w = (scale * jax.random.normal(kw, (cout, 9 * cin))).astype(jnp.float32)
        b = (scale * jax.random.normal(kb, (cout, 1))).astype(jnp.float32)
        return w, b

    irn = {k: [] for k in ("wF", "bF", "wH", "bH", "wG", "bG")}
    for _ in range(block_num):
        key, kf, kh, kg = jax.random.split(key, 4)
        wF, bF = conv_p(kf, c_hi, c_ho)    # F: hi -> ho
        wH, bH = conv_p(kh, c_ho, c_hi)    # H: ho -> hi
        wG, bG = conv_p(kg, c_ho, c_hi)    # G: ho -> hi
        for name, v in (("wF", wF), ("bF", bF), ("wH", wH), ("bH", bH), ("wG", wG), ("bG", bG)):
            irn[name].append(v)
    irn = {k: jnp.stack(v, axis=0) for k, v in irn.items()}

    key, ki = jax.random.split(key)
    wi, bi = conv_p(ki, c_ho, nf)
    pm = {"wi": wi, "bi": bi, "w1": [], "b1": [], "w2": [], "b2": []}
    for _ in range(block_num_rbm):
        key, k1, k2 = jax.random.split(key, 3)
        w1, b1 = conv_p(k1, nf, nf)
        w2, b2 = conv_p(k2, nf, nf)
        pm["w1"].append(w1); pm["b1"].append(b1); pm["w2"].append(w2); pm["b2"].append(b2)
    for k in ("w1", "b1", "w2", "b2"):
        pm[k] = jnp.stack(pm[k], axis=0)
    return {"irn": irn, "pm": pm}


def vsn_forward(params, x, x_h=None, rev=False, grid_n=None):
    """Mirrors VSN.forward; x, x_h are NCHW float32 arrays."""
    N, c_ho, H, W = x.shape
    c_hi = params["irn"]["wF"].shape[2] // 9
    nf = params["pm"]["wi"].shape[0]
    CP = _ceil8(max(c_ho, c_hi, nf))
    if grid_n is None:
        grid_n = _default_grid_n(N)
    if N % grid_n != 0 or ((N // grid_n) * H * W) % 128 != 0:
        grid_n = 1                                  # fall back to one full-batch block
    mask = _tap_masks_packed(H, W, N, CP)
    xp = _pack(x, CP)
    if not rev:
        y1p, y2p = _irn_fwd_call(params["irn"], mask, xp, _pack(x_h, CP), W, CP, grid_n)
        return _unpack(y1p, N, c_ho, H, W), _unpack(y2p, N, c_hi, H, W)
    elif x_h is None:
        y1p, y2p, zp = _pm_irn_rev_call(params, mask, xp, W, CP, grid_n)
        # out_z.unsqueeze(1).view(-1, channel_in, H, W) is the identity here (nf == channel_in_hi).
        return (_unpack(y1p, N, c_ho, H, W), _unpack(y2p, N, c_hi, H, W),
                _unpack(zp, N, nf, H, W))
    else:
        # TODO(synk): the original branch returns the undefined name `pred_message`
        # (it would raise NameError in PyTorch too); not reproducible.
        raise NotImplementedError("rev=True with x_h is broken in the reference module")


# ----------------------------------------------------------------------------
# Pure-JAX reference (for correctness checking only)
# ----------------------------------------------------------------------------

def _conv_ref(x, w, b, act="none"):
    Cout, Cin = w.shape[0], x.shape[1]
    k = w.reshape(Cout, 3, 3, Cin).transpose(0, 3, 1, 2)          # OIHW
    y = jax.lax.conv_general_dilated(x, k, (1, 1), "SAME",
                                     dimension_numbers=("NCHW", "OIHW", "NCHW"))
    y = y + b.reshape(1, Cout, 1, 1)
    if act == "leaky":
        y = jnp.where(y >= 0, y, 0.2 * y)
    return y


def _e_ref(s):
    return jnp.exp(2.0 * (jax.nn.sigmoid(s) - 0.5))


def _irn_ref(p, x1, x2, rev):
    nb = p["wF"].shape[0]
    for i in (reversed(range(nb)) if rev else range(nb)):
        wF, bF = p["wF"][i], p["bF"][i, :, 0]
        wH, bH = p["wH"][i], p["bH"][i, :, 0]
        wG, bG = p["wG"][i], p["bG"][i, :, 0]
        if not rev:
            y1 = x1 + _conv_ref(x2, wF, bF)
            s1 = _conv_ref(y1, wH, bH)
            t1 = _conv_ref(y1, wG, bG)
            x1, x2 = y1, _e_ref(s1) * x2 + t1
        else:
            s1 = _conv_ref(x1, wH, bH)
            t1 = _conv_ref(x1, wG, bG)
            y2 = (x2 - t1) / _e_ref(s1)
            x1, x2 = x1 - _conv_ref(y2, wF, bF), y2
    return x1, x2


def _pm_ref(p, x):
    h = _conv_ref(x, p["wi"], p["bi"][:, 0])
    for i in range(p["w1"].shape[0]):
        t = _conv_ref(h, p["w1"][i], p["b1"][i, :, 0], act="leaky")
        t = _conv_ref(t, p["w2"][i], p["b2"][i, :, 0])
        h = h + t
    return h


# ----------------------------------------------------------------------------

if __name__ == "__main__":
    # opt['network_G'] equivalent (small synthetic config)
    opt = {"network_G": {"in_hi_nc": 4, "in_ho_nc": 4, "block_num": [2], "block_num_rbm": 2}}
    c_hi = opt["network_G"]["in_hi_nc"]
    c_ho = opt["network_G"]["in_ho_nc"]
    nf = c_hi                                   # self.nf = self.channel_in_hi
    block_num = opt["network_G"]["block_num"][0]
    block_num_rbm = opt["network_G"]["block_num_rbm"]

    key = jax.random.PRNGKey(0)
    key, kp, kx, kxh = jax.random.split(key, 4)
    params = init_vsn_params(kp, c_ho, c_hi, nf, block_num, block_num_rbm)

    N, H, W = 2, 16, 16
    x = jax.random.normal(kx, (N, c_ho, H, W), jnp.float32)      # NCHW, like PyTorch
    x_h = jax.random.normal(kxh, (N, c_hi, H, W), jnp.float32)

    # ---- forward (rev=False) ----
    y1, y2 = vsn_forward(params, x, x_h, rev=False)
    jax.block_until_ready((y1, y2))
    r1, r2 = _irn_ref(params["irn"], x, x_h, rev=False)
    assert jnp.allclose(y1, r1, atol=2e-3, rtol=2e-3)
    assert jnp.allclose(y2, r2, atol=2e-3, rtol=2e-3)

    # ---- reverse (rev=True, x_h=None): PM + reverse IRN fused in one kernel ----
    ox, oxh, oz = vsn_forward(params, x, None, rev=True)
    jax.block_until_ready((ox, oxh, oz))
    rz = _pm_ref(params["pm"], x)
    r1, r2 = _irn_ref(params["irn"], x, rz, rev=True)
    assert jnp.allclose(oz, rz, atol=2e-3, rtol=2e-3)
    assert jnp.allclose(ox, r1, atol=2e-3, rtol=2e-3)
    assert jnp.allclose(oxh, r2, atol=2e-3, rtol=2e-3)

    print("KERNEL_OK")
</pallas_src>

<mosaic_0001>
module attributes {stable_mosaic.version = 11 : i64} {
  func.func @_irn_fwd_kernel(%arg0: i32, %arg1: memref<72x512xf32, #tpu.memory_space<vmem>>, %arg2: memref<8x512xf32, #tpu.memory_space<vmem>>, %arg3: memref<8x512xf32, #tpu.memory_space<vmem>>, %arg4: memref<2x8x72xf32, #tpu.memory_space<vmem>>, %arg5: memref<2x8x1xf32, #tpu.memory_space<vmem>>, %arg6: memref<2x16x72xf32, #tpu.memory_space<vmem>>, %arg7: memref<2x16x1xf32, #tpu.memory_space<vmem>>, %arg8: memref<8x512xf32, #tpu.memory_space<vmem>>, %arg9: memref<8x512xf32, #tpu.memory_space<vmem>>) attributes {dimension_semantics = [#tpu.dimension_semantics<parallel>], iteration_bounds = array<i64: 1>, scalar_prefetch = 0 : i64, scratch_operands = 0 : i64, tpu.core_type = #tpu.core_type<tc>, window_params = [{transform_indices = @transform_0, window_bounds = array<i64: 72, 512>}, {transform_indices = @transform_1, window_bounds = array<i64: 8, 512>}, {transform_indices = @transform_2, window_bounds = array<i64: 8, 512>}, {pipeline_mode = #tpu.pipeline_mode<synchronous>, transform_indices = @transform_3, window_bounds = array<i64: 2, 8, 72>}, {pipeline_mode = #tpu.pipeline_mode<synchronous>, transform_indices = @transform_4, window_bounds = array<i64: 2, 8, 1>}, {pipeline_mode = #tpu.pipeline_mode<synchronous>, transform_indices = @transform_5, window_bounds = array<i64: 2, 16, 72>}, {pipeline_mode = #tpu.pipeline_mode<synchronous>, transform_indices = @transform_6, window_bounds = array<i64: 2, 16, 1>}, {transform_indices = @transform_7, window_bounds = array<i64: 8, 512>}, {transform_indices = @transform_8, window_bounds = array<i64: 8, 512>}]} {
    %c0 = arith.constant 0 : index
    %c0_0 = arith.constant 0 : index
    %0 = vector.load %arg1[%c0, %c0_0] : memref<72x512xf32, #tpu.memory_space<vmem>>, vector<8x512xf32>
    %c8 = arith.constant 8 : index
    %c0_1 = arith.constant 0 : index
    %1 = vector.load %arg1[%c8, %c0_1] : memref<72x512xf32, #tpu.memory_space<vmem>>, vector<8x512xf32>
    %c16 = arith.constant 16 : index
    %c0_2 = arith.constant 0 : index
    %2 = vector.load %arg1[%c16, %c0_2] : memref<72x512xf32, #tpu.memory_space<vmem>>, vector<8x512xf32>
    %c24 = arith.constant 24 : index
    %c0_3 = arith.constant 0 : index
    %3 = vector.load %arg1[%c24, %c0_3] : memref<72x512xf32, #tpu.memory_space<vmem>>, vector<8x512xf32>
    %c40 = arith.constant 40 : index
    %c0_4 = arith.constant 0 : index
    %4 = vector.load %arg1[%c40, %c0_4] : memref<72x512xf32, #tpu.memory_space<vmem>>, vector<8x512xf32>
    %c48 = arith.constant 48 : index
    %c0_5 = arith.constant 0 : index
    %5 = vector.load %arg1[%c48, %c0_5] : memref<72x512xf32, #tpu.memory_space<vmem>>, vector<8x512xf32>
    %c56 = arith.constant 56 : index
    %c0_6 = arith.constant 0 : index
    %6 = vector.load %arg1[%c56, %c0_6] : memref<72x512xf32, #tpu.memory_space<vmem>>, vector<8x512xf32>
    %c64 = arith.constant 64 : index
    %c0_7 = arith.constant 0 : index
    %7 = vector.load %arg1[%c64, %c0_7] : memref<72x512xf32, #tpu.memory_space<vmem>>, vector<8x512xf32>
    %c0_8 = arith.constant 0 : index
    %c0_9 = arith.constant 0 : index
    %8 = vector.load %arg2[%c0_8, %c0_9] : memref<8x512xf32, #tpu.memory_space<vmem>>, vector<8x512xf32>
    %c0_10 = arith.constant 0 : index
    %c0_11 = arith.constant 0 : index
    %9 = vector.load %arg3[%c0_10, %c0_11] : memref<8x512xf32, #tpu.memory_space<vmem>>, vector<8x512xf32>
    %c0_12 = arith.constant 0 : index
    %c0_13 = arith.constant 0 : index
    %c0_14 = arith.constant 0 : index
    %10 = vector.load %arg4[%c0_12, %c0_13, %c0_14] : memref<2x8x72xf32, #tpu.memory_space<vmem>>, vector<1x8x72xf32>
    %11 = vector.shape_cast %10 : vector<1x8x72xf32> to vector<8x72xf32>
    %c0_15 = arith.constant 0 : index
    %c0_16 = arith.constant 0 : index
    %c0_17 = arith.constant 0 : index
    %12 = vector.load %arg5[%c0_15, %c0_16, %c0_17] : memref<2x8x1xf32, #tpu.memory_space<vmem>>, vector<1x8x1xf32>
    %13 = vector.shape_cast %12 : vector<1x8x1xf32> to vector<8x1xf32>
    %c17_i32 = arith.constant 17 : i32
    %14 = tpu.dynamic_rotate %9 by %c17_i32 dim 1 : vector<8x512xf32>, i32 -> vector<8x512xf32>
    %15 = arith.mulf %14, %0 : vector<8x512xf32>
    %c16_i32 = arith.constant 16 : i32
    %16 = tpu.dynamic_rotate %9 by %c16_i32 dim 1 : vector<8x512xf32>, i32 -> vector<8x512xf32>
    %17 = arith.mulf %16, %1 : vector<8x512xf32>
    %c15_i32 = arith.constant 15 : i32
    %18 = tpu.dynamic_rotate %9 by %c15_i32 dim 1 : vector<8x512xf32>, i32 -> vector<8x512xf32>
    %19 = arith.mulf %18, %2 : vector<8x512xf32>
    %c1_i32 = arith.constant 1 : i32
    %20 = tpu.dynamic_rotate %9 by %c1_i32 dim 1 : vector<8x512xf32>, i32 -> vector<8x512xf32>
    %21 = arith.mulf %20, %3 : vector<8x512xf32>
    %c511_i32 = arith.constant 511 : i32
    %22 = tpu.dynamic_rotate %9 by %c511_i32 dim 1 : vector<8x512xf32>, i32 -> vector<8x512xf32>
    %23 = arith.mulf %22, %4 : vector<8x512xf32>
    %c497_i32 = arith.constant 497 : i32
    %24 = tpu.dynamic_rotate %9 by %c497_i32 dim 1 : vector<8x512xf32>, i32 -> vector<8x512xf32>
    %25 = arith.mulf %24, %5 : vector<8x512xf32>
    %c496_i32 = arith.constant 496 : i32
    %26 = tpu.dynamic_rotate %9 by %c496_i32 dim 1 : vector<8x512xf32>, i32 -> vector<8x512xf32>
    %27 = arith.mulf %26, %6 : vector<8x512xf32>
    %c495_i32 = arith.constant 495 : i32
    %28 = tpu.dynamic_rotate %9 by %c495_i32 dim 1 : vector<8x512xf32>, i32 -> vector<8x512xf32>
    %29 = arith.mulf %28, %7 : vector<8x512xf32>
    %30 = tpu.concatenate %15, %17, %19, %21, %9, %23, %25, %27, %29 in 0 : vector<8x512xf32>, vector<8x512xf32>, vector<8x512xf32>, vector<8x512xf32>, vector<8x512xf32>, vector<8x512xf32>, vector<8x512xf32>, vector<8x512xf32>, vector<8x512xf32> -> vector<72x512xf32>
    %cst = arith.constant dense<0.000000e+00> : vector<8x512xf32>
    %31 = tpu.matmul %11, %30, %cst {dimension_numbers = #tpu.dot_dimension_numbers<[1], [0], [0], [1], [0, 0, 1, 1], [], []>} : vector<8x72xf32>, vector<72x512xf32>, vector<8x512xf32> -> vector<8x512xf32>
    %32 = vector.broadcast %13 : vector<8x1xf32> to vector<8x512xf32>
    %33 = arith.addf %31, %32 : vector<8x512xf32>
    %34 = arith.addf %8, %33 : vector<8x512xf32>
    %c0_18 = arith.constant 0 : index
    %c0_19 = arith.constant 0 : index
    %c0_20 = arith.constant 0 : index
    %35 = vector.load %arg6[%c0_18, %c0_19, %c0_20] : memref<2x16x72xf32, #tpu.memory_space<vmem>>, vector<1x16x72xf32>
    %36 = vector.shape_cast %35 : vector<1x16x72xf32> to vector<16x72xf32>
    %c0_21 = arith.constant 0 : index
    %c0_22 = arith.constant 0 : index
    %c0_23 = arith.constant 0 : index
    %37 = vector.load %arg7[%c0_21, %c0_22, %c0_23] : memref<2x16x1xf32, #tpu.memory_space<vmem>>, vector<1x16x1xf32>
    %38 = vector.shape_cast %37 : vector<1x16x1xf32> to vector<16x1xf32>
    %c17_i32_24 = arith.constant 17 : i32
    %39 = tpu.dynamic_rotate %34 by %c17_i32_24 dim 1 : vector<8x512xf32>, i32 -> vector<8x512xf32>
    %40 = arith.mulf %39, %0 : vector<8x512xf32>
    %c16_i32_25 = arith.constant 16 : i32
    %41 = tpu.dynamic_rotate %34 by %c16_i32_25 dim 1 : vector<8x512xf32>, i32 -> vector<8x512xf32>
    %42 = arith.mulf %41, %1 : vector<8x512xf32>
    %c15_i32_26 = arith.constant 15 : i32
    %43 = tpu.dynamic_rotate %34 by %c15_i32_26 dim 1 : vector<8x512xf32>, i32 -> vector<8x512xf32>
    %44 = arith.mulf %43, %2 : vector<8x512xf32>
    %c1_i32_27 = arith.constant 1 : i32
    %45 = tpu.dynamic_rotate %34 by %c1_i32_27 dim 1 : vector<8x512xf32>, i32 -> vector<8x512xf32>
    %46 = arith.mulf %45, %3 : vector<8x512xf32>
    %c511_i32_28 = arith.constant 511 : i32
    %47 = tpu.dynamic_rotate %34 by %c511_i32_28 dim 1 : vector<8x512xf32>, i32 -> vector<8x512xf32>
    %48 = arith.mulf %47, %4 : vector<8x512xf32>
    %c497_i32_29 = arith.constant 497 : i32
    %49 = tpu.dynamic_rotate %34 by %c497_i32_29 dim 1 : vector<8x512xf32>, i32 -> vector<8x512xf32>
    %50 = arith.mulf %49, %5 : vector<8x512xf32>
    %c496_i32_30 = arith.constant 496 : i32
    %51 = tpu.dynamic_rotate %34 by %c496_i32_30 dim 1 : vector<8x512xf32>, i32 -> vector<8x512xf32>
    %52 = arith.mulf %51, %6 : vector<8x512xf32>
    %c495_i32_31 = arith.constant 495 : i32
    %53 = tpu.dynamic_rotate %34 by %c495_i32_31 dim 1 : vector<8x512xf32>, i32 -> vector<8x512xf32>
    %54 = arith.mulf %53, %7 : vector<8x512xf32>
    %55 = tpu.concatenate %40, %42, %44, %46, %34, %48, %50, %52, %54 in 0 : vector<8x512xf32>, vector<8x512xf32>, vector<8x512xf32>, vector<8x512xf32>, vector<8x512xf32>, vector<8x512xf32>, vector<8x512xf32>, vector<8x512xf32>, vector<8x512xf32> -> vector<72x512xf32>
    %cst_32 = arith.constant dense<0.000000e+00> : vector<16x512xf32>
    %56 = tpu.matmul %36, %55, %cst_32 {dimension_numbers = #tpu.dot_dimension_numbers<[1], [0], [0], [1], [0, 0, 1, 1], [], []>} : vector<16x72xf32>, vector<72x512xf32>, vector<16x512xf32> -> vector<16x512xf32>
    %57 = vector.broadcast %38 : vector<16x1xf32> to vector<16x512xf32>
    %58 = arith.addf %56, %57 : vector<16x512xf32>
    %59 = vector.extract_strided_slice %58 {offsets = [0, 0], sizes = [8, 512], strides = [1, 1]} : vector<16x512xf32> to vector<8x512xf32>
    %60 = vector.extract_strided_slice %58 {offsets = [8, 0], sizes = [8, 512], strides = [1, 1]} : vector<16x512xf32> to vector<8x512xf32>
    %61 = arith.negf %59 : vector<8x512xf32>
    %62 = math.exp %61 : vector<8x512xf32>
    %cst_33 = arith.constant 1.000000e+00 : f32
    %63 = vector.broadcast %cst_33 : f32 to vector<8x512xf32>
    %64 = arith.addf %63, %62 : vector<8x512xf32>
    %65 = arith.divf %63, %64 : vector<8x512xf32>
    %cst_34 = arith.constant 5.000000e-01 : f32
    %66 = vector.broadcast %cst_34 : f32 to vector<8x512xf32>
    %67 = arith.subf %65, %66 : vector<8x512xf32>
    %cst_35 = arith.constant 2.000000e+00 : f32
    %68 = vector.broadcast %cst_35 : f32 to vector<8x512xf32>
    %69 = arith.mulf %68, %67 : vector<8x512xf32>
    %70 = math.exp %69 : vector<8x512xf32>
    %71 = arith.mulf %70, %9 : vector<8x512xf32>
    %72 = arith.addf %71, %60 : vector<8x512xf32>
    %c1 = arith.constant 1 : index
    %c0_36 = arith.constant 0 : index
    %c0_37 = arith.constant 0 : index
    %73 = vector.load %arg4[%c1, %c0_36, %c0_37] : memref<2x8x72xf32, #tpu.memory_space<vmem>>, vector<1x8x72xf32>
    %74 = vector.shape_cast %73 : vector<1x8x72xf32> to vector<8x72xf32>
    %c1_38 = arith.constant 1 : index
    %c0_39 = arith.constant 0 : index
    %c0_40 = arith.constant 0 : index
    %75 = vector.load %arg5[%c1_38, %c0_39, %c0_40] : memref<2x8x1xf32, #tpu.memory_space<vmem>>, vector<1x8x1xf32>
    %76 = vector.shape_cast %75 : vector<1x8x1xf32> to vector<8x1xf32>
    %c17_i32_41 = arith.constant 17 : i32
    %77 = tpu.dynamic_rotate %72 by %c17_i32_41 dim 1 : vector<8x512xf32>, i32 -> vector<8x512xf32>
    %78 = arith.mulf %77, %0 : vector<8x512xf32>
    %c16_i32_42 = arith.constant 16 : i32
    %79 = tpu.dynamic_rotate %72 by %c16_i32_42 dim 1 : vector<8x512xf32>, i32 -> vector<8x512xf32>
    %80 = arith.mulf %79, %1 : vector<8x512xf32>
    %c15_i32_43 = arith.constant 15 : i32
    %81 = tpu.dynamic_rotate %72 by %c15_i32_43 dim 1 : vector<8x512xf32>, i32 -> vector<8x512xf32>
    %82 = arith.mulf %81, %2 : vector<8x512xf32>
    %c1_i32_44 = arith.constant 1 : i32
    %83 = tpu.dynamic_rotate %72 by %c1_i32_44 dim 1 : vector<8x512xf32>, i32 -> vector<8x512xf32>
    %84 = arith.mulf %83, %3 : vector<8x512xf32>
    %c511_i32_45 = arith.constant 511 : i32
    %85 = tpu.dynamic_rotate %72 by %c511_i32_45 dim 1 : vector<8x512xf32>, i32 -> vector<8x512xf32>
    %86 = arith.mulf %85, %4 : vector<8x512xf32>
    %c497_i32_46 = arith.constant 497 : i32
    %87 = tpu.dynamic_rotate %72 by %c497_i32_46 dim 1 : vector<8x512xf32>, i32 -> vector<8x512xf32>
    %88 = arith.mulf %87, %5 : vector<8x512xf32>
    %c496_i32_47 = arith.constant 496 : i32
    %89 = tpu.dynamic_rotate %72 by %c496_i32_47 dim 1 : vector<8x512xf32>, i32 -> vector<8x512xf32>
    %90 = arith.mulf %89, %6 : vector<8x512xf32>
    %c495_i32_48 = arith.constant 495 : i32
    %91 = tpu.dynamic_rotate %72 by %c495_i32_48 dim 1 : vector<8x512xf32>, i32 -> vector<8x512xf32>
    %92 = arith.mulf %91, %7 : vector<8x512xf32>
    %93 = tpu.concatenate %78, %80, %82, %84, %72, %86, %88, %90, %92 in 0 : vector<8x512xf32>, vector<8x512xf32>, vector<8x512xf32>, vector<8x512xf32>, vector<8x512xf32>, vector<8x512xf32>, vector<8x512xf32>, vector<8x512xf32>, vector<8x512xf32> -> vector<72x512xf32>
    %cst_49 = arith.constant dense<0.000000e+00> : vector<8x512xf32>
    %94 = tpu.matmul %74, %93, %cst_49 {dimension_numbers = #tpu.dot_dimension_numbers<[1], [0], [0], [1], [0, 0, 1, 1], [], []>} : vector<8x72xf32>, vector<72x512xf32>, vector<8x512xf32> -> vector<8x512xf32>
    %95 = vector.broadcast %76 : vector<8x1xf32> to vector<8x512xf32>
    %96 = arith.addf %94, %95 : vector<8x512xf32>
    %97 = arith.addf %34, %96 : vector<8x512xf32>
    %c1_50 = arith.constant 1 : index
    %c0_51 = arith.constant 0 : index
    %c0_52 = arith.constant 0 : index
    %98 = vector.load %arg6[%c1_50, %c0_51, %c0_52] : memref<2x16x72xf32, #tpu.memory_space<vmem>>, vector<1x16x72xf32>
    %99 = vector.shape_cast %98 : vector<1x16x72xf32> to vector<16x72xf32>
    %c1_53 = arith.constant 1 : index
    %c0_54 = arith.constant 0 : index
    %c0_55 = arith.constant 0 : index
    %100 = vector.load %arg7[%c1_53, %c0_54, %c0_55] : memref<2x16x1xf32, #tpu.memory_space<vmem>>, vector<1x16x1xf32>
    %101 = vector.shape_cast %100 : vector<1x16x1xf32> to vector<16x1xf32>
    %c17_i32_56 = arith.constant 17 : i32
    %102 = tpu.dynamic_rotate %97 by %c17_i32_56 dim 1 : vector<8x512xf32>, i32 -> vector<8x512xf32>
    %103 = arith.mulf %102, %0 : vector<8x512xf32>
    %c16_i32_57 = arith.constant 16 : i32
    %104 = tpu.dynamic_rotate %97 by %c16_i32_57 dim 1 : vector<8x512xf32>, i32 -> vector<8x512xf32>
    %105 = arith.mulf %104, %1 : vector<8x512xf32>
    %c15_i32_58 = arith.constant 15 : i32
    %106 = tpu.dynamic_rotate %97 by %c15_i32_58 dim 1 : vector<8x512xf32>, i32 -> vector<8x512xf32>
    %107 = arith.mulf %106, %2 : vector<8x512xf32>
    %c1_i32_59 = arith.constant 1 : i32
    %108 = tpu.dynamic_rotate %97 by %c1_i32_59 dim 1 : vector<8x512xf32>, i32 -> vector<8x512xf32>
    %109 = arith.mulf %108, %3 : vector<8x512xf32>
    %c511_i32_60 = arith.constant 511 : i32
    %110 = tpu.dynamic_rotate %97 by %c511_i32_60 dim 1 : vector<8x512xf32>, i32 -> vector<8x512xf32>
    %111 = arith.mulf %110, %4 : vector<8x512xf32>
    %c497_i32_61 = arith.constant 497 : i32
    %112 = tpu.dynamic_rotate %97 by %c497_i32_61 dim 1 : vector<8x512xf32>, i32 -> vector<8x512xf32>
    %113 = arith.mulf %112, %5 : vector<8x512xf32>
    %c496_i32_62 = arith.constant 496 : i32
    %114 = tpu.dynamic_rotate %97 by %c496_i32_62 dim 1 : vector<8x512xf32>, i32 -> vector<8x512xf32>
    %115 = arith.mulf %114, %6 : vector<8x512xf32>
    %c495_i32_63 = arith.constant 495 : i32
    %116 = tpu.dynamic_rotate %97 by %c495_i32_63 dim 1 : vector<8x512xf32>, i32 -> vector<8x512xf32>
    %117 = arith.mulf %116, %7 : vector<8x512xf32>
    %118 = tpu.concatenate %103, %105, %107, %109, %97, %111, %113, %115, %117 in 0 : vector<8x512xf32>, vector<8x512xf32>, vector<8x512xf32>, vector<8x512xf32>, vector<8x512xf32>, vector<8x512xf32>, vector<8x512xf32>, vector<8x512xf32>, vector<8x512xf32> -> vector<72x512xf32>
    %cst_64 = arith.constant dense<0.000000e+00> : vector<16x512xf32>
    %119 = tpu.matmul %99, %118, %cst_64 {dimension_numbers = #tpu.dot_dimension_numbers<[1], [0], [0], [1], [0, 0, 1, 1], [], []>} : vector<16x72xf32>, vector<72x512xf32>, vector<16x512xf32> -> vector<16x512xf32>
    %120 = vector.broadcast %101 : vector<16x1xf32> to vector<16x512xf32>
    %121 = arith.addf %119, %120 : vector<16x512xf32>
    %122 = vector.extract_strided_slice %121 {offsets = [0, 0], sizes = [8, 512], strides = [1, 1]} : vector<16x512xf32> to vector<8x512xf32>
    %123 = vector.extract_strided_slice %121 {offsets = [8, 0], sizes = [8, 512], strides = [1, 1]} : vector<16x512xf32> to vector<8x512xf32>
    %124 = arith.negf %122 : vector<8x512xf32>
    %125 = math.exp %124 : vector<8x512xf32>
    %cst_65 = arith.constant 1.000000e+00 : f32
    %126 = vector.broadcast %cst_65 : f32 to vector<8x512xf32>
    %127 = arith.addf %126, %125 : vector<8x512xf32>
    %128 = arith.divf %126, %127 : vector<8x512xf32>
    %cst_66 = arith.constant 5.000000e-01 : f32
    %129 = vector.broadcast %cst_66 : f32 to vector<8x512xf32>
    %130 = arith.subf %128, %129 : vector<8x512xf32>
    %cst_67 = arith.constant 2.000000e+00 : f32
    %131 = vector.broadcast %cst_67 : f32 to vector<8x512xf32>
    %132 = arith.mulf %131, %130 : vector<8x512xf32>
    %133 = math.exp %132 : vector<8x512xf32>
    %134 = arith.mulf %133, %72 : vector<8x512xf32>
    %135 = arith.addf %134, %123 : vector<8x512xf32>
    %c0_68 = arith.constant 0 : index
    %c0_69 = arith.constant 0 : index
    %136 = vector.load %arg8[%c0_68, %c0_69] : memref<8x512xf32, #tpu.memory_space<vmem>>, vector<8x512xf32>
    tpu.vector_store %arg8[%c0_68, %c0_69], %97 {strides = array<i32>} : memref<8x512xf32, #tpu.memory_space<vmem>>, vector<8x512xf32>,
    %c0_70 = arith.constant 0 : index
    %c0_71 = arith.constant 0 : index
    %137 = vector.load %arg9[%c0_70, %c0_71] : memref<8x512xf32, #tpu.memory_space<vmem>>, vector<8x512xf32>
    tpu.vector_store %arg9[%c0_70, %c0_71], %135 {strides = array<i32>} : memref<8x512xf32, #tpu.memory_space<vmem>>, vector<8x512xf32>,
    return
  }
  func.func @transform_0(%arg0: i32) -> (i32, i32) {
    %c0_i32 = arith.constant 0 : i32
    %c0_i32_0 = arith.constant 0 : i32
    return %c0_i32, %arg0 : i32, i32
  }
  func.func @transform_1(%arg0: i32) -> (i32, i32) {
    %c0_i32 = arith.constant 0 : i32
    %c0_i32_0 = arith.constant 0 : i32
    return %c0_i32, %arg0 : i32, i32
  }
  func.func @transform_2(%arg0: i32) -> (i32, i32) {
    %c0_i32 = arith.constant 0 : i32
    %c0_i32_0 = arith.constant 0 : i32
    return %c0_i32, %arg0 : i32, i32
  }
  func.func @transform_3(%arg0: i32) -> (i32, i32, i32) {
    %c0_i32 = arith.constant 0 : i32
    %c0_i32_0 = arith.constant 0 : i32
    %c0_i32_1 = arith.constant 0 : i32
    %c0_i32_2 = arith.constant 0 : i32
    return %c0_i32, %c0_i32_0, %c0_i32_1 : i32, i32, i32
  }
  func.func @transform_4(%arg0: i32) -> (i32, i32, i32) {
    %c0_i32 = arith.constant 0 : i32
    %c0_i32_0 = arith.constant 0 : i32
    %c0_i32_1 = arith.constant 0 : i32
    %c0_i32_2 = arith.constant 0 : i32
    return %c0_i32, %c0_i32_0, %c0_i32_1 : i32, i32, i32
  }
  func.func @transform_5(%arg0: i32) -> (i32, i32, i32) {
    %c0_i32 = arith.constant 0 : i32
    %c0_i32_0 = arith.constant 0 : i32
    %c0_i32_1 = arith.constant 0 : i32
    %c0_i32_2 = arith.constant 0 : i32
    return %c0_i32, %c0_i32_0, %c0_i32_1 : i32, i32, i32
  }
  func.func @transform_6(%arg0: i32) -> (i32, i32, i32) {
    %c0_i32 = arith.constant 0 : i32
    %c0_i32_0 = arith.constant 0 : i32
    %c0_i32_1 = arith.constant 0 : i32
    %c0_i32_2 = arith.constant 0 : i32
    return %c0_i32, %c0_i32_0, %c0_i32_1 : i32, i32, i32
  }
  func.func @transform_7(%arg0: i32) -> (i32, i32) {
    %c0_i32 = arith.constant 0 : i32
    %c0_i32_0 = arith.constant 0 : i32
    return %c0_i32, %arg0 : i32, i32
  }
  func.func @transform_8(%arg0: i32) -> (i32, i32) {
    %c0_i32 = arith.constant 0 : i32
    %c0_i32_0 = arith.constant 0 : i32
    return %c0_i32, %arg0 : i32, i32
  }
}

</mosaic_0001>

<bundles_post_ra>
// kernel: tpu_custom_call.1
= control target key start
LH: loop header
LB: loop body
LE: loop exit
PB: predicated region body
PF: predicated region fallthrough
CT: control target
= control target key end

     0   :  { %14 = vsyncpa [#allocation3], 0  ;;  %s2753_s0 = inlined_call_operand.hbm [shape: f32[72,512], index: 0, kind: input, shape index: {}]   ;;  %s2754_s1 = inlined_call_operand.vmem [shape: f32[8,512], index: 1, kind: input, shape index: {}]   ;;  %s2755_s2 = inlined_call_operand.hbm [shape: f32[8,512], index: 2, kind: input, shape index: {}]   ;;  %s2756_s3 = inlined_call_operand.hbm [shape: f32[2,8,72], index: 3, kind: input, shape index: {}]   ;;  %s2757_s4 = inlined_call_operand.vmem [shape: f32[2,8,1], index: 4, kind: input, shape index: {}]   ;;  %s2758_s5 = inlined_call_operand.vmem [shape: f32[2,16,72], index: 5, kind: input, shape index: {}]   ;;  %s2759_s6 = inlined_call_operand.vmem [shape: f32[2,16,1], index: 6, kind: input, shape index: {}]   ;;  %s2760_s7 = inlined_call_operand.hbm [shape: f32[8,512], index: 7, kind: output, shape index: {0}]   ;;  %s2761_s8 = inlined_call_operand.hbm [shape: f32[8,512], index: 8, kind: output, shape index: {1}]  }
   0x1   :  { %15 = vsyncpa [#allocation6], 0 }
   0x2   :  { %16 = vsyncpa [#allocation4], 0 }
   0x3   :  { %17 = vsyncpa [#allocation10], 0  ;;  %s1810_s27 = smov [#allocation5]   ;;  %s1811_s29 = smov [#allocation2]  }
   0x4   :  { %s38_s28 = sshll.u32 %s1810_s27, 4  ;;  %s23_s30 = sshll.u32 %s1811_s29, 4  ;;  %s39_s28 = int_to_ptr.vmem [resolvable:$true] %s38_s28  ;;  %s1874_s30 = int_to_ptr.vmem [resolvable:$true] %s23_s30 }
   0x5   :  { %s1692_s11 = scalar_lea.hbm %s2755_s2, 512 }
   0x6   :  { %p1693_p0 = scmp.ne.s32.totalorder %s2755_s2, %s1692_s11  ;;  %p1696_p1 = scmp.lt.u32.totalorder %s1692_s11, %s2755_s2 }
   0x8   :  { %p1698_p2 = pnand %p1696_p1, %p1693_p0 }
   0xa   :  { %1701 = shalt.err (!%p1698_p2)
}
   0xb   :  { %s1702_s16 = scalar_lea.vmem %s39_s28, 512  ;;  %p1707_p4 = scmp.lt.s32.totalorder %s39_s28, %s39_s28 }
   0xc   :  { %p1703_p3 = scmp.ne.s32.totalorder %s39_s28, %s1702_s16  ;;  %p1708_p5 = scmp.lt.s32.totalorder %s1702_s16, %s1702_s16 }
   0xe   :  { %p1709_p6 = por %p1708_p5, %p1707_p4 }
  0x10   :  { %p1710_p7 = pnand %p1709_p6, %p1703_p3 }
  0x12   :  { %1713 = shalt.err (!%p1710_p7)
}
  0x13   :  { %41 = dma.hbm_to_vmem [thread:$0]  %s2755_s2, 512, %s39_s28, [#allocation6]  }
  0x14   :  { %s1714_s21 = scalar_lea.hbm %s2753_s0, 4608 }
  0x15   :  { %p1715_p8 = scmp.ne.s32.totalorder %s2753_s0, %s1714_s21  ;;  %p1718_p9 = scmp.lt.u32.totalorder %s1714_s21, %s2753_s0 }
  0x17   :  { %p1720_p10 = pnand %p1718_p9, %p1715_p8 }
  0x19   :  { %1723 = shalt.err (!%p1720_p10)
}
  0x1a   :  { %s1724_s26 = scalar_lea.vmem %s1874_s30, 4608  ;;  %p1729_p12 = scmp.lt.s32.totalorder %s1874_s30, %s1874_s30 }
  0x1b   :  { %p1725_p11 = scmp.ne.s32.totalorder %s1874_s30, %s1724_s26  ;;  %p1730_p13 = scmp.lt.s32.totalorder %s1724_s26, %s1724_s26 }
  0x1d   :  { %p1731_p0 = por %p1730_p13, %p1729_p12 }
  0x1f   :  { %p1732_p1 = pnand %p1731_p0, %p1725_p11 }
  0x21   :  { %1735 = shalt.err (!%p1732_p1)
}
  0x22   :  { %s1812_s2 = smov 512   ;;  %s1813_s27 = smov 32  }
  0x23   :  { %29 = dma.hbm_to_vmem [thread:$0]  %s2753_s0, 4608, %s1874_s30, [#allocation3], %s1812_s2, %s1812_s2, %s1813_s27  }
  0x24   :  { %s1814_s9 = smov [#allocation7]   ;;  %s1736_s13 = scalar_lea.hbm %s2756_s3, 256 }
  0x25   :  { %s47_s10 = sshll.u32 %s1814_s9, 4  ;;  %p1737_p2 = scmp.ne.s32.totalorder %s2756_s3, %s1736_s13  ;;  %s48_s10 = int_to_ptr.vmem [resolvable:$true] %s47_s10 }
  0x26   :  { %p1740_p3 = scmp.lt.u32.totalorder %s1736_s13, %s2756_s3 }
  0x28   :  { %p1742_p4 = pnand %p1740_p3, %p1737_p2 }
  0x2a   :  { %1745 = shalt.err (!%p1742_p4)
}
  0x2b   :  { %s1746_s18 = scalar_lea.vmem %s48_s10, 256  ;;  %p1751_p6 = scmp.lt.s32.totalorder %s48_s10, %s48_s10 }
  0x2c   :  { %p1747_p5 = scmp.ne.s32.totalorder %s48_s10, %s1746_s18  ;;  %p1752_p7 = scmp.lt.s32.totalorder %s1746_s18, %s1746_s18 }
  0x2e   :  { %p1753_p8 = por %p1752_p7, %p1751_p6 }
  0x30   :  { %p1754_p9 = pnand %p1753_p8, %p1747_p5 }
  0x32   :  { %1757 = shalt.err (!%p1754_p9)
}
  0x33   :  { %s1815_s0 = smov 128   ;;  %s1816_s30 = smov 8  }
  0x34   :  { %53 = dma.hbm_to_vmem [thread:$0]  %s2756_s3, 256, %s48_s10, [#allocation6], %s1815_s0, %s1815_s0, %s1816_s30  }
  0x35   :  { %1802 = dma.done.wait [#allocation3], 4608  }
  0x36   :  { %1803 = vsyncadd [#allocation3], 4294962688 }
  0x37   :  { %1804 = dma.done.wait [#allocation6], 768  }
  0x38   :  { %1805 = vsyncadd [#allocation6], 4294966528  ;;  %v1917_v0 = vld [vmem:[#allocation5 + $0x10] sm:$0xff]  ;;  %v1919_v1 = vld [vmem:[#allocation5] sm:$0xff]  ;;  %s1817_s21 = smov 17   ;;  %s1818_s3 = smov 16   ;;  %v119_v7 = vlaneseq }
  0x39   :  { %115 = vrot.lane.b32.xlu1 %v1917_v0, %s1817_s21  ;;  %111 = vrot.lane.b32.xlu0 %v1919_v1, %s1817_s21  ;;  %v1925_v2 = vld [vmem:[#allocation5 + $0x18] sm:$0xff]  ;;  %v1927_v3 = vld [vmem:[#allocation5 + $0x8] sm:$0xff]  ;;  %s1819_s22 = smov 15   ;;  %s1820_s23 = smov 1   ;;  %v1824_v4 = vmov 0.0   ;;  %v1825_v5 = vmov 0  }
  0x3a   :  { %s1821_s24 = smov 127   ;;  %s1822_s25 = smov 113   ;;  %322 = vmatprep.mubr.f32.mxu0 %v1824_v4  ;;  %393 = vmatprep.mubr.f32.mxu1 %v1824_v4  ;;  %v110_v6 = vld [vmem:[%s2757_s4] sm:$0xff]  ;;  %v1994_v10 = vand.u32 127, %v119_v7  ;;  %v1998_v13 = vld [vmem:[#allocation2 + $0x8] sm:$0xff]  ;;  %v2014_v24 = vld [vmem:[#allocation2 + $0x18] sm:$0xff] }
  0x3b   :  { %s1823_s26 = smov 112   ;;  %1610 = vset.pattern.permute.xlu0 %v1825_v5  ;;  %1611 = vset.pattern.permute.xlu1 %v1825_v5  ;;  %s1826_s2 = smov 111   ;;  %v2000_v14 = vld [vmem:[#allocation2 + $0x28] sm:$0xff]  ;;  %v2008_v20 = vld [vmem:[#allocation2] sm:$0xff]  ;;  %v2020_v27 = vld [vmem:[#allocation2 + $0x38] sm:$0xff]  ;;  %vm254_vm8 = vcmask 588800  }
  0x3c   :  { %vm121_vm0 = vcmp.lt.s32.totalorder %v1994_v10, 17  ;;  %vm138_vm1 = vcmp.lt.s32.totalorder %v1994_v10, 16  ;;  %v2012_v23 = vld [vmem:[#allocation2 + $0x20] sm:$0xff]  ;;  %v2022_v28 = vld [vmem:[#allocation2 + $0x10] sm:$0xff]  ;;  %vm155_vm2 = vcmp.lt.s32.totalorder %v1994_v10, 15  ;;  %vm172_vm3 = vcmp.lt.s32.totalorder %v1994_v10, 1 }
  0x3d   :  { %117 = vrot.lane.b32.xlu1 %v1925_v2, %s1817_s21  ;;  %113 = vrot.lane.b32.xlu0 %v1927_v3, %s1817_s21  ;;  %v2024_v29 = vld [vmem:[#allocation2 + $0x30] sm:$0xff]  ;;  %v2040_v49 = vld [vmem:[#allocation2 + $0x48] sm:$0xff]  ;;  %v2046_v54 = vld [vmem:[#allocation2 + $0x40] sm:$0xff]  ;;  %vm189_vm4 = vcmp.lt.s32.totalorder %v1994_v10, 127  ;;  %vm223_vm5 = vcmp.lt.s32.totalorder %v1994_v10, 112  ;;  %vm206_vm6 = vcmp.lt.s32.totalorder %v1994_v10, 113 }
  0x3e   :  { %v2044_v51 = vld [vmem:[#allocation2 + $0x68] sm:$0xff]  ;;  %v2053_v58 = vld [vmem:[#allocation2 + $0x50] sm:$0xff]  ;;  %v2055_v59 = vld [vmem:[#allocation2 + $0x58] sm:$0xff]  ;;  %vm240_vm7 = vcmp.lt.s32.totalorder %v1994_v10, 111 }
  0x3f   :  { %v2062_v63 = vld [vmem:[#allocation2 + $0x60] sm:$0xff]  ;;  %v2064_v5 = vld [vmem:[#allocation2 + $0x70] sm:$0xff]  ;;  %v1448_v10 = vld [vmem:[%s2758_s5 + $0x18] sm:$0xff] }
  0x41   :  { %132 = vrot.lane.b32.xlu1 %v1927_v3, %s1818_s3  ;;  %130 = vrot.lane.b32.xlu0 %v1919_v1, %s1818_s3 }
  0x45   :  { %136 = vrot.lane.b32.xlu1 %v1925_v2, %s1818_s3  ;;  %134 = vrot.lane.b32.xlu0 %v1917_v0, %s1818_s3 }
  0x49   :  { %149 = vrot.lane.b32.xlu1 %v1927_v3, %s1819_s22  ;;  %147 = vrot.lane.b32.xlu0 %v1919_v1, %s1819_s22 }
  0x4d   :  { %153 = vrot.lane.b32.xlu1 %v1925_v2, %s1819_s22  ;;  %151 = vrot.lane.b32.xlu0 %v1917_v0, %s1819_s22 }
  0x51   :  { %166 = vrot.lane.b32.xlu1 %v1927_v3, %s1820_s23  ;;  %164 = vrot.lane.b32.xlu0 %v1919_v1, %s1820_s23 }
  0x55   :  { %170 = vrot.lane.b32.xlu1 %v1925_v2, %s1820_s23  ;;  %168 = vrot.lane.b32.xlu0 %v1917_v0, %s1820_s23 }
  0x59   :  { %183 = vrot.lane.b32.xlu1 %v1927_v3, %s1821_s24  ;;  %181 = vrot.lane.b32.xlu0 %v1919_v1, %s1821_s24 }
  0x5d   :  { %187 = vrot.lane.b32.xlu1 %v1925_v2, %s1821_s24  ;;  %185 = vrot.lane.b32.xlu0 %v1917_v0, %s1821_s24 }
  0x61   :  { %200 = vrot.lane.b32.xlu1 %v1927_v3, %s1822_s25  ;;  %198 = vrot.lane.b32.xlu0 %v1919_v1, %s1822_s25 }
  0x65   :  { %204 = vrot.lane.b32.xlu1 %v1925_v2, %s1822_s25  ;;  %202 = vrot.lane.b32.xlu0 %v1917_v0, %s1822_s25 }
  0x69   :  { %217 = vrot.lane.b32.xlu1 %v1927_v3, %s1823_s26  ;;  %215 = vrot.lane.b32.xlu0 %v1919_v1, %s1823_s26 }
  0x6d   :  { %221 = vrot.lane.b32.xlu1 %v1925_v2, %s1823_s26  ;;  %219 = vrot.lane.b32.xlu0 %v1917_v0, %s1823_s26 }
  0x71   :  { %234 = vrot.lane.b32.xlu1 %v1927_v3, %s1826_s2  ;;  %232 = vrot.lane.b32.xlu0 %v1919_v1, %s1826_s2 }
  0x75   :  { %238 = vrot.lane.b32.xlu1 %v1925_v2, %s1826_s2  ;;  %236 = vrot.lane.b32.xlu0 %v1917_v0, %s1826_s2 }
  0x79   :  { %251 = vperm.xlu0 %1610, %v110_v6   ;;  %v2066_v6 = vld [vmem:[#allocation2 + $0x78] sm:$0xff] }
  0xab   :  { %v116_v8 = vpop.permute.xlu1 %115  ;;  %v112_v9 = vpop.permute.xlu0 %111 }
  0xaf   :  { %v118_v11 = vpop.permute.xlu1 %117  ;;  %v114_v12 = vpop.permute.xlu0 %113 }
  0xb0   :  { %v124_v15 = vsel %vm121_vm0, %v112_v9, %v114_v12  ;;  %v125_v18 = vsel %vm121_vm0, %v118_v11, %v112_v9  ;;  %v122_v25 = vsel %vm121_vm0, %v116_v8, %v118_v11  ;;  %v123_v26 = vsel %vm121_vm0, %v114_v12, %v116_v8 }
  0xb1   :  { %v127_v21 = vmul.f32 %v124_v15, %v1998_v13  ;;  %v126_v33 = vmul.f32 %v125_v18, %v2008_v20  ;;  %v129_v36 = vmul.f32 %v122_v25, %v2014_v24  ;;  %v128_v40 = vmul.f32 %v123_v26, %v2022_v28 }
  0xb3   :  { %v133_v16 = vpop.permute.xlu1 %132  ;;  %v131_v17 = vpop.permute.xlu0 %130 }
  0xb4   :  { %v141_v19 = vsel %vm138_vm1, %v131_v17, %v133_v16 }
  0xb5   :  { %v144_v22 = vmul.f32 %v141_v19, %v2000_v14 }
  0xb7   :  { %v137_v30 = vpop.permute.xlu1 %136  ;;  %v135_v31 = vpop.permute.xlu0 %134  ;;  %v1463_v32 = vpack.c.bf16 %v144_v22, %v127_v21 }
  0xb8   :  { %v142_v34 = vsel %vm138_vm1, %v137_v30, %v131_v17  ;;  %v140_v35 = vsel %vm138_vm1, %v133_v16, %v135_v31  ;;  %v139_v37 = vsel %vm138_vm1, %v135_v31, %v137_v30 }
  0xb9   :  { %1464 = vmatprep.subr.bf16.mxu0 %v1463_v32  ;;  %v143_v38 = vmul.f32 %v142_v34, %v2012_v23  ;;  %v146_v39 = vmul.f32 %v139_v37, %v2020_v27  ;;  %v145_v41 = vmul.f32 %v140_v35, %v2024_v29  ;;  %v2085_v35 = vld [vmem:[#allocation2 + $0xb8] sm:$0xff]  ;;  %v2089_v37 = vld [vmem:[#allocation2 + $0xb0] sm:$0xff] }
  0xbb   :  { %v150_v42 = vpop.permute.xlu1 %149  ;;  %v148_v43 = vpop.permute.xlu0 %147  ;;  %v1465_v44 = vpack.c.bf16 %v143_v38, %v126_v33  ;;  %v1479_v45 = vpack.c.bf16 %v146_v39, %v129_v36  ;;  %v1481_v46 = vpack.c.bf16 %v145_v41, %v128_v40  ;;  %v2081_v33 = vld [vmem:[#allocation2 + $0xa0] sm:$0xff]  ;;  %v2087_v36 = vld [vmem:[#allocation2 + $0xa8] sm:$0xff] }
  0xbc   :  { %v158_v50 = vsel %vm155_vm2, %v148_v43, %v150_v42 }
  0xbd   :  { %1466 = vmatpush1.bf16.msra.mxu0 %v1465_v44  ;;  %1480 = vmatprep.subr.bf16.mxu1 %v1479_v45  ;;  %v161_v57 = vmul.f32 %v158_v50, %v2040_v49 }
  0xbe   :  { %1482 = vmatpush1.bf16.msra.mxu1 %v1481_v46 }
  0xbf   :  { %v154_v47 = vpop.permute.xlu1 %153  ;;  %v152_v48 = vpop.permute.xlu0 %151 }
  0xc0   :  { %v159_v55 = vsel %vm155_vm2, %v154_v47, %v148_v43  ;;  %v157_v60 = vsel %vm155_vm2, %v150_v42, %v152_v48  ;;  %v156_v62 = vsel %vm155_vm2, %v152_v48, %v154_v47 }
  0xc1   :  { %v160_v7 = vmul.f32 %v159_v55, %v2046_v54  ;;  %v162_v12 = vmul.f32 %v157_v60, %v2053_v58  ;;  %v163_v18 = vmul.f32 %v156_v62, %v2055_v59  ;;  %v2107_v62 = vld [vmem:[#allocation2 + $0xd8] sm:$0xff] }
  0xc3   :  { %v167_v52 = vpop.permute.xlu1 %166  ;;  %v165_v53 = vpop.permute.xlu0 %164 }
  0xc4   :  { %v175_v56 = vsel %vm172_vm3, %v165_v53, %v167_v52 }
  0xc5   :  { %v178_v61 = vmul.f32 %v175_v56, %v2044_v51 }
  0xc7   :  { %v171_v8 = vpop.permute.xlu1 %170  ;;  %v169_v9 = vpop.permute.xlu0 %168  ;;  %v1467_v11 = vpack.c.bf16 %v178_v61, %v161_v57 }
  0xc8   :  { %v176_v15 = vsel %vm172_vm3, %v171_v8, %v165_v53  ;;  %v173_v16 = vsel %vm172_vm3, %v169_v9, %v171_v8  ;;  %v174_v17 = vsel %vm172_vm3, %v167_v52, %v169_v9  ;;  %v2111_v8 = vld [vmem:[#allocation2 + $0xc8] sm:$0xff] }
  0xc9   :  { %v177_v19 = vmul.f32 %v176_v15, %v2062_v63  ;;  %v179_v21 = vmul.f32 %v174_v17, %v2064_v5  ;;  %v180_v22 = vmul.f32 %v173_v16, %v2066_v6  ;;  %1468 = vmatprep.subr.bf16.mxu0 %v1467_v11  ;;  %v2115_v11 = vld [vmem:[#allocation2 + $0xd0] sm:$0xff]  ;;  %v2123_v17 = vld [vmem:[#allocation2 + $0xf8] sm:$0xff] }
  0xcb   :  { %v184_v25 = vpop.permute.xlu1 %183  ;;  %v182_v26 = vpop.permute.xlu0 %181  ;;  %v1469_v30 = vpack.c.bf16 %v177_v19, %v160_v7  ;;  %v1483_v31 = vpack.c.bf16 %v180_v22, %v163_v18  ;;  %v1485_v32 = vpack.c.bf16 %v179_v21, %v162_v12  ;;  %v2117_v12 = vld [vmem:[#allocation2 + $0xe0] sm:$0xff]  ;;  %v2125_v18 = vld [vmem:[#allocation2 + $0xe8] sm:$0xff]  ;;  %v2127_v19 = vld [vmem:[#allocation2 + $0xf0] sm:$0xff] }
  0xcc   :  { %v192_v34 = vsel %vm189_vm4, %v182_v26, %v184_v25  ;;  %v2129_v21 = vld [vmem:[#allocation2 + $0xc0] sm:$0xff] }
  0xcd   :  { %1470 = vmatpush1.bf16.msra.mxu0 %v1469_v30  ;;  %1484 = vmatprep.subr.bf16.mxu1 %v1483_v31  ;;  %v194_v40 = vmul.f32 %v192_v34, %v2081_v33 }
  0xce   :  { %1486 = vmatpush1.bf16.msra.mxu1 %v1485_v32 }
  0xcf   :  { %v188_v38 = vpop.permute.xlu1 %187  ;;  %v186_v39 = vpop.permute.xlu0 %185  ;;  %v1473_v55 = vpack.c.bf16 %v194_v40, %v1919_v1 }
  0xd0   :  { %v193_v41 = vsel %vm189_vm4, %v188_v38, %v182_v26  ;;  %v190_v42 = vsel %vm189_vm4, %v186_v39, %v188_v38  ;;  %v191_v43 = vsel %vm189_vm4, %v184_v25, %v186_v39 }
  0xd1   :  { %v197_v44 = vmul.f32 %v193_v41, %v2085_v35  ;;  %v195_v45 = vmul.f32 %v191_v43, %v2087_v36  ;;  %v196_v46 = vmul.f32 %v190_v42, %v2089_v37 }
  0xd3   :  { %v201_v47 = vpop.permute.xlu1 %200  ;;  %v199_v48 = vpop.permute.xlu0 %198  ;;  %v1471_v50 = vpack.c.bf16 %v195_v45, %v1927_v3  ;;  %v1487_v52 = vpack.c.bf16 %v197_v44, %v1925_v2  ;;  %v1489_v53 = vpack.c.bf16 %v196_v46, %v1917_v0 }
  0xd4   :  { %v209_v22 = vsel %vm206_vm6, %v199_v48, %v201_v47 }
  0xd5   :  { %1472 = vmatprep.subr.bf16.mxu0 %v1471_v50  ;;  %1488 = vmatprep.subr.bf16.mxu1 %v1487_v52  ;;  %v211_v44 = vmul.f32 %v209_v22, %v2129_v21 }
  0xd6   :  { %1474 = vmatpush1.bf16.msra.mxu0 %v1473_v55  ;;  %1490 = vmatpush1.bf16.msra.mxu1 %v1489_v53  ;;  %v2148_v53 = vld [vmem:[#allocation2 + $0x108] sm:$0xff]  ;;  %v2150_v55 = vld [vmem:[#allocation2 + $0x118] sm:$0xff] }
  0xd7   :  { %v205_v56 = vpop.permute.xlu1 %204  ;;  %v203_v57 = vpop.permute.xlu0 %202 }
  0xd8   :  { %v210_v7 = vsel %vm206_vm6, %v205_v56, %v199_v48  ;;  %v208_v9 = vsel %vm206_vm6, %v201_v47, %v203_v57  ;;  %v207_v16 = vsel %vm206_vm6, %v203_v57, %v205_v56  ;;  %v2152_v56 = vld [vmem:[#allocation2 + $0x110] sm:$0xff] }
  0xd9   :  { %v214_v25 = vmul.f32 %v210_v7, %v2107_v62  ;;  %v212_v26 = vmul.f32 %v208_v9, %v2111_v8  ;;  %v213_v40 = vmul.f32 %v207_v16, %v2115_v11  ;;  %v2156_v7 = vld [vmem:[#allocation2 + $0x100] sm:$0xff] }
  0xdb   :  { %v218_v60 = vpop.permute.xlu1 %217  ;;  %v216_v61 = vpop.permute.xlu0 %215 }
  0xdc   :  { %v226_v15 = vsel %vm223_vm5, %v216_v61, %v218_v60 }
  0xdd   :  { %v228_v32 = vmul.f32 %v226_v15, %v2117_v12 }
  0xdf   :  { %v222_v30 = vpop.permute.xlu1 %221  ;;  %v220_v31 = vpop.permute.xlu0 %219  ;;  %v1477_v52 = vpack.c.bf16 %v228_v32, %v211_v44 }
  0xe0   :  { %v227_v34 = vsel %vm223_vm5, %v222_v30, %v216_v61  ;;  %v224_v38 = vsel %vm223_vm5, %v220_v31, %v222_v30  ;;  %v225_v39 = vsel %vm223_vm5, %v218_v60, %v220_v31  ;;  %v109_v31 = vld [vmem:[#allocation7] sm:$0xff] }
  0xe1   :  { %v231_v41 = vmul.f32 %v227_v34, %v2123_v17  ;;  %v229_v42 = vmul.f32 %v225_v39, %v2125_v18  ;;  %v230_v43 = vmul.f32 %v224_v38, %v2127_v19  ;;  %v101_v34 = vld [vmem:[%s2754_s1] sm:$0xff]  ;;  %v103_v39 = vld [vmem:[%s2754_s1 + $0x10] sm:$0xff] }
  0xe3   :  { %v235_v45 = vpop.permute.xlu1 %234  ;;  %v233_v46 = vpop.permute.xlu0 %232  ;;  %v1475_v47 = vpack.c.bf16 %v229_v42, %v212_v26  ;;  %v1491_v48 = vpack.c.bf16 %v231_v41, %v214_v25  ;;  %v1493_v50 = vpack.c.bf16 %v230_v43, %v213_v40 }
  0xe4   :  { %v243_v57 = vsel %vm240_vm7, %v233_v46, %v235_v45 }
  0xe5   :  { %1476 = vmatprep.subr.bf16.mxu0 %v1475_v47  ;;  %1492 = vmatprep.subr.bf16.mxu1 %v1491_v48  ;;  %v245_v30 = vmul.f32 %v243_v57, %v2156_v7  ;;  %v102_v48 = vld [vmem:[%s2754_s1 + $0x8] sm:$0xff]  ;;  %v104_v57 = vld [vmem:[%s2754_s1 + $0x18] sm:$0xff] }
  0xe6   :  { %1478 = vmatpush1.bf16.msra.mxu0 %v1477_v52  ;;  %1494 = vmatpush1.bf16.msra.mxu1 %v1493_v50 }
  0xe7   :  { %v239_v60 = vpop.permute.xlu1 %238  ;;  %v237_v61 = vpop.permute.xlu0 %236 }
  0xe8   :  { %v244_v9 = vsel %vm240_vm7, %v239_v60, %v233_v46  ;;  %v241_v15 = vsel %vm240_vm7, %v237_v61, %v239_v60  ;;  %v242_v16 = vsel %vm240_vm7, %v235_v45, %v237_v61  ;;  %v406_v61 = vld [vmem:[%s2759_s6] sm:$0xff] }
  0xe9   :  { %v246_v22 = vmul.f32 %v242_v16, %v2148_v53  ;;  %v248_v25 = vmul.f32 %v244_v9, %v2150_v55  ;;  %v247_v26 = vmul.f32 %v241_v15, %v2152_v56  ;;  %v407_v9 = vld [vmem:[%s2759_s6 + $0x8] sm:$0xff] }
  0xeb   :  { %274 = vmatprep.subr.mxu0 %v246_v22  ;;  %345 = vmatprep.subr.mxu1 %v248_v25 }
  0xec   :  { %275 = vmatpush1.msra.mxu0 %v245_v30  ;;  %346 = vmatpush1.msra.mxu1 %v247_v26 }
  0xed   :  { %1430 = vmatmul.mubr.msk.f32.vlgmr.msra.gmra.mrb[0].mxu0 %vm254_vm8, %v109_v31  ;;  %1431 = vmatmul.mubr.msk.f32.vlgmr.msra.gmra.mrb[0].mxu1 %vm254_vm8, %v109_v31 }
  0xee   :  { %616 = vmatprep.mubr.f32.mxu0 %v1824_v4  ;;  %693 = vmatprep.mubr.f32.mxu1 %v1824_v4 }
  0xf8   :  { %v252_v32 = vpop.permute.xlu0 %251 }
 0x1c0   :  { %v324_v38 = vpop.f32.mrb[0].mxu0  ;;  %v395_v40 = vpop.f32.mrb[0].mxu1 }
 0x1c1   :  { %v325_v41 = vadd.f32 %v324_v38, %v252_v32  ;;  %v396_v42 = vadd.f32 %v395_v40, %v252_v32  ;;  %v326_v43 = vpop.f32.mrb[1].mxu0  ;;  %v397_v44 = vpop.f32.mrb[1].mxu1 }
 0x1c2   :  { %v327_v47 = vadd.f32 %v326_v43, %v252_v32  ;;  %v398_v52 = vadd.f32 %v397_v44, %v252_v32 }
 0x1c3   :  { %v2178_v45 = vadd.f32 %v325_v41, %v101_v34  ;;  %v2180_v46 = vadd.f32 %v396_v42, %v103_v39 }
 0x1c4   :  { %v2189_v50 = vadd.f32 %v327_v47, %v102_v48  ;;  %v2198_v60 = vadd.f32 %v398_v52, %v104_v57 }
 0x1c5   :  { %412 = vrot.lane.b32.xlu0 %v2180_v46, %s1817_s21  ;;  %408 = vrot.lane.b32.xlu1 %v2178_v45, %s1817_s21 }
 0x1c9   :  { %424 = vrot.lane.b32.xlu0 %v2178_v45, %s1818_s3  ;;  %410 = vrot.lane.b32.xlu1 %v2189_v50, %s1817_s21 }
 0x1cd   :  { %428 = vrot.lane.b32.xlu0 %v2180_v46, %s1818_s3  ;;  %414 = vrot.lane.b32.xlu1 %v2198_v60, %s1817_s21 }
 0x1d1   :  { %440 = vrot.lane.b32.xlu0 %v2178_v45, %s1819_s22  ;;  %426 = vrot.lane.b32.xlu1 %v2189_v50, %s1818_s3 }
 0x1d5   :  { %444 = vrot.lane.b32.xlu0 %v2180_v46, %s1819_s22  ;;  %430 = vrot.lane.b32.xlu1 %v2198_v60, %s1818_s3 }
 0x1d9   :  { %456 = vrot.lane.b32.xlu0 %v2178_v45, %s1820_s23  ;;  %442 = vrot.lane.b32.xlu1 %v2189_v50, %s1819_s22 }
 0x1dd   :  { %460 = vrot.lane.b32.xlu0 %v2180_v46, %s1820_s23  ;;  %446 = vrot.lane.b32.xlu1 %v2198_v60, %s1819_s22 }
 0x1e1   :  { %472 = vrot.lane.b32.xlu0 %v2178_v45, %s1821_s24  ;;  %458 = vrot.lane.b32.xlu1 %v2189_v50, %s1820_s23 }
 0x1e5   :  { %476 = vrot.lane.b32.xlu0 %v2180_v46, %s1821_s24  ;;  %462 = vrot.lane.b32.xlu1 %v2198_v60, %s1820_s23 }
 0x1e9   :  { %488 = vrot.lane.b32.xlu0 %v2178_v45, %s1822_s25  ;;  %474 = vrot.lane.b32.xlu1 %v2189_v50, %s1821_s24 }
 0x1ed   :  { %492 = vrot.lane.b32.xlu0 %v2180_v46, %s1822_s25  ;;  %478 = vrot.lane.b32.xlu1 %v2198_v60, %s1821_s24 }
 0x1f1   :  { %504 = vrot.lane.b32.xlu0 %v2178_v45, %s1823_s26  ;;  %490 = vrot.lane.b32.xlu1 %v2189_v50, %s1822_s25 }
 0x1f5   :  { %508 = vrot.lane.b32.xlu0 %v2180_v46, %s1823_s26  ;;  %494 = vrot.lane.b32.xlu1 %v2198_v60, %s1822_s25 }
 0x1f9   :  { %520 = vrot.lane.b32.xlu0 %v2178_v45, %s1826_s2  ;;  %506 = vrot.lane.b32.xlu1 %v2189_v50, %s1823_s26 }
 0x1fd   :  { %524 = vrot.lane.b32.xlu0 %v2180_v46, %s1826_s2  ;;  %510 = vrot.lane.b32.xlu1 %v2198_v60, %s1823_s26 }
 0x201   :  { %538 = vperm.xlu0 %1610, %v406_v61   ;;  %522 = vrot.lane.b32.xlu1 %v2189_v50, %s1826_s2 }
 0x205   :  { %526 = vrot.lane.b32.xlu1 %v2198_v60, %s1826_s2 }
 0x209   :  { %543 = vperm.xlu1 %1611, %v407_v9  }
 0x237   :  { %v413_v15 = vpop.permute.xlu0 %412  ;;  %v409_v16 = vpop.permute.xlu1 %408 }
 0x23b   :  { %v425_v22 = vpop.permute.xlu0 %424  ;;  %v411_v25 = vpop.permute.xlu1 %410 }
 0x23c   :  { %v418_v31 = vsel %vm121_vm0, %v409_v16, %v411_v25  ;;  %v417_v44 = vsel %vm121_vm0, %v411_v25, %v413_v15 }
 0x23d   :  { %v421_v39 = vmul.f32 %v418_v31, %v1998_v13 }
 0x23f   :  { %v429_v26 = vpop.permute.xlu0 %428  ;;  %v415_v30 = vpop.permute.xlu1 %414 }
 0x240   :  { %v416_v42 = vsel %vm121_vm0, %v413_v15, %v415_v30  ;;  %v419_v43 = vsel %vm121_vm0, %v415_v30, %v409_v16  ;;  %v422_v15 = vmul.f32 %v417_v44, %v2022_v28 }
 0x241   :  { %v420_v31 = vmul.f32 %v419_v43, %v2008_v20 }
 0x243   :  { %v441_v32 = vpop.permute.xlu0 %440  ;;  %v427_v34 = vpop.permute.xlu1 %426 }
 0x244   :  { %v434_v38 = vsel %vm138_vm1, %v425_v22, %v427_v34  ;;  %v433_v40 = vsel %vm138_vm1, %v427_v34, %v429_v26  ;;  %v423_v34 = vmul.f32 %v416_v42, %v2014_v24 }
 0x245   :  { %v437_v41 = vmul.f32 %v434_v38, %v2000_v14  ;;  %v438_v57 = vmul.f32 %v433_v40, %v2024_v29 }
 0x247   :  { %v445_v47 = vpop.permute.xlu0 %444  ;;  %v431_v48 = vpop.permute.xlu1 %430  ;;  %v1495_v52 = vpack.c.bf16 %v437_v41, %v421_v39  ;;  %v1513_v41 = vpack.c.bf16 %v438_v57, %v422_v15 }
 0x248   :  { %v432_v61 = vsel %vm138_vm1, %v429_v26, %v431_v48  ;;  %v435_v9 = vsel %vm138_vm1, %v431_v48, %v425_v22 }
 0x249   :  { %v436_v16 = vmul.f32 %v435_v9, %v2012_v23  ;;  %v439_v30 = vmul.f32 %v432_v61, %v2020_v27  ;;  %1496 = vmatprep.subr.bf16.mxu0 %v1495_v52 }
 0x24b   :  { %v1497_v25 = vpack.c.bf16 %v436_v16, %v420_v31  ;;  %v457_v38 = vpop.permute.xlu0 %456  ;;  %v443_v39 = vpop.permute.xlu1 %442  ;;  %v1511_v40 = vpack.c.bf16 %v439_v30, %v423_v34 }
 0x24c   :  { %v450_v42 = vsel %vm155_vm2, %v441_v32, %v443_v39  ;;  %v449_v34 = vsel %vm155_vm2, %v443_v39, %v445_v47 }
 0x24d   :  { %1498 = vmatpush1.bf16.msra.mxu0 %v1497_v25  ;;  %1512 = vmatprep.subr.bf16.mxu1 %v1511_v40  ;;  %v453_v44 = vmul.f32 %v450_v42, %v2040_v49 }
 0x24e   :  { %1514 = vmatpush1.bf16.msra.mxu1 %v1513_v41 }
 0x24f   :  { %v461_v22 = vpop.permute.xlu0 %460  ;;  %v447_v26 = vpop.permute.xlu1 %446 }
 0x250   :  { %v448_v9 = vsel %vm155_vm2, %v445_v47, %v447_v26  ;;  %v451_v31 = vsel %vm155_vm2, %v447_v26, %v441_v32  ;;  %v454_v47 = vmul.f32 %v449_v34, %v2053_v58 }
 0x251   :  { %v452_v42 = vmul.f32 %v451_v31, %v2046_v54 }
 0x253   :  { %v473_v43 = vpop.permute.xlu0 %472  ;;  %v459_v48 = vpop.permute.xlu1 %458 }
 0x254   :  { %v466_v52 = vsel %vm172_vm3, %v457_v38, %v459_v48  ;;  %v465_v61 = vsel %vm172_vm3, %v459_v48, %v461_v22  ;;  %v455_v48 = vmul.f32 %v448_v9, %v2055_v59 }
 0x255   :  { %v469_v57 = vmul.f32 %v466_v52, %v2044_v51  ;;  %v470_v25 = vmul.f32 %v465_v61, %v2064_v5 }
 0x257   :  { %v477_v16 = vpop.permute.xlu0 %476  ;;  %v463_v30 = vpop.permute.xlu1 %462  ;;  %v1499_v15 = vpack.c.bf16 %v469_v57, %v453_v44  ;;  %v1517_v57 = vpack.c.bf16 %v470_v25, %v454_v47 }
 0x258   :  { %v464_v40 = vsel %vm172_vm3, %v461_v22, %v463_v30  ;;  %v467_v41 = vsel %vm172_vm3, %v463_v30, %v457_v38 }
 0x259   :  { %v468_v32 = vmul.f32 %v467_v41, %v2062_v63  ;;  %v471_v26 = vmul.f32 %v464_v40, %v2066_v6  ;;  %1500 = vmatprep.subr.bf16.mxu0 %v1499_v15 }
 0x25b   :  { %v1501_v39 = vpack.c.bf16 %v468_v32, %v452_v42  ;;  %v489_v52 = vpop.permute.xlu0 %488  ;;  %v475_v44 = vpop.permute.xlu1 %474  ;;  %v1515_v61 = vpack.c.bf16 %v471_v26, %v455_v48 }
 0x25c   :  { %v481_v22 = vsel %vm189_vm4, %v475_v44, %v477_v16  ;;  %v482_v38 = vsel %vm189_vm4, %v473_v43, %v475_v44 }
 0x25d   :  { %v484_v9 = vmul.f32 %v482_v38, %v2081_v33  ;;  %v485_v31 = vmul.f32 %v481_v22, %v2087_v36  ;;  %1502 = vmatpush1.bf16.msra.mxu0 %v1501_v39  ;;  %1516 = vmatprep.subr.bf16.mxu1 %v1515_v61 }
 0x25e   :  { %1518 = vmatpush1.bf16.msra.mxu1 %v1517_v57 }
 0x25f   :  { %v1505_v34 = vpack.c.bf16 %v484_v9, %v2178_v45  ;;  %v493_v30 = vpop.permute.xlu0 %492  ;;  %v479_v15 = vpop.permute.xlu1 %478  ;;  %v1503_v40 = vpack.c.bf16 %v485_v31, %v2189_v50 }
 0x260   :  { %v480_v25 = vsel %vm189_vm4, %v477_v16, %v479_v15  ;;  %v483_v41 = vsel %vm189_vm4, %v479_v15, %v473_v43 }
 0x261   :  { %v486_v42 = vmul.f32 %v480_v25, %v2089_v37  ;;  %v487_v48 = vmul.f32 %v483_v41, %v2085_v35  ;;  %1504 = vmatprep.subr.bf16.mxu0 %v1503_v40 }
 0x262   :  { %1506 = vmatpush1.bf16.msra.mxu0 %v1505_v34 }
 0x263   :  { %v1521_v32 = vpack.c.bf16 %v486_v42, %v2180_v46  ;;  %v505_v26 = vpop.permute.xlu0 %504  ;;  %v491_v47 = vpop.permute.xlu1 %490  ;;  %v1519_v39 = vpack.c.bf16 %v487_v48, %v2198_v60 }
 0x264   :  { %v497_v16 = vsel %vm206_vm6, %v491_v47, %v493_v30  ;;  %v498_v43 = vsel %vm206_vm6, %v489_v52, %v491_v47 }
 0x265   :  { %1520 = vmatprep.subr.bf16.mxu1 %v1519_v39  ;;  %v500_v9 = vmul.f32 %v498_v43, %v2129_v21  ;;  %v501_v31 = vmul.f32 %v497_v16, %v2111_v8 }
 0x266   :  { %1522 = vmatpush1.bf16.msra.mxu1 %v1521_v32 }
 0x267   :  { %v509_v44 = vpop.permute.xlu0 %508  ;;  %v495_v61 = vpop.permute.xlu1 %494 }
 0x268   :  { %v496_v25 = vsel %vm206_vm6, %v493_v30, %v495_v61  ;;  %v499_v41 = vsel %vm206_vm6, %v495_v61, %v489_v52 }
 0x269   :  { %v502_v16 = vmul.f32 %v496_v25, %v2115_v11  ;;  %v503_v43 = vmul.f32 %v499_v41, %v2107_v62 }
 0x26b   :  { %v507_v57 = vpop.permute.xlu1 %506  ;;  %v521_v34 = vpop.permute.xlu0 %520 }
 0x26c   :  { %v513_v22 = vsel %vm223_vm5, %v507_v57, %v509_v44  ;;  %v514_v38 = vsel %vm223_vm5, %v505_v26, %v507_v57 }
 0x26d   :  { %v516_v15 = vmul.f32 %v514_v38, %v2117_v12  ;;  %v517_v40 = vmul.f32 %v513_v22, %v2125_v18 }
 0x26f   :  { %v1509_v42 = vpack.c.bf16 %v516_v15, %v500_v9  ;;  %v511_v48 = vpop.permute.xlu1 %510  ;;  %v1507_v32 = vpack.c.bf16 %v517_v40, %v501_v31  ;;  %v525_v52 = vpop.permute.xlu0 %524  ;;  %v404_v15 = vld [vmem:[%s2758_s5] sm:$0xff] }
 0x270   :  { %v512_v47 = vsel %vm223_vm5, %v509_v44, %v511_v48  ;;  %v515_v39 = vsel %vm223_vm5, %v511_v48, %v505_v26 }
 0x271   :  { %v518_v57 = vmul.f32 %v512_v47, %v2127_v19  ;;  %v519_v30 = vmul.f32 %v515_v39, %v2123_v17  ;;  %1508 = vmatprep.subr.bf16.mxu0 %v1507_v32  ;;  %v405_v32 = vld [vmem:[%s2758_s5 + $0x8] sm:$0xff] }
 0x272   :  { %1510 = vmatpush1.bf16.msra.mxu0 %v1509_v42 }
 0x273   :  { %v1525_v61 = vpack.c.bf16 %v518_v57, %v502_v16  ;;  %v523_v22 = vpop.permute.xlu1 %522  ;;  %v1523_v38 = vpack.c.bf16 %v519_v30, %v503_v43 }
 0x274   :  { %v529_v44 = vsel %vm240_vm7, %v523_v22, %v525_v52  ;;  %v530_v26 = vsel %vm240_vm7, %v521_v34, %v523_v22 }
 0x275   :  { %v532_v9 = vmul.f32 %v530_v26, %v2156_v7  ;;  %v533_v31 = vmul.f32 %v529_v44, %v2148_v53  ;;  %1524 = vmatprep.subr.bf16.mxu1 %v1523_v38 }
 0x276   :  { %1526 = vmatpush1.bf16.msra.mxu1 %v1525_v61 }
 0x277   :  { %568 = vmatprep.subr.mxu0 %v533_v31  ;;  %v527_v40 = vpop.permute.xlu1 %526 }
 0x278   :  { %v528_v25 = vsel %vm240_vm7, %v525_v52, %v527_v40  ;;  %v531_v41 = vsel %vm240_vm7, %v527_v40, %v521_v34  ;;  %569 = vmatpush1.msra.mxu0 %v532_v9 }
 0x279   :  { %v534_v42 = vmul.f32 %v528_v25, %v2152_v56  ;;  %v535_v48 = vmul.f32 %v531_v41, %v2150_v55  ;;  %1432 = vmatmul.mubr.msk.f32.vlgmr.msra.gmra.mrb[2].mxu0 %vm254_vm8, %v404_v15 }
 0x27a   :  { %622 = vmatprep.mubr.f32.mxu0 %v1824_v4 }
 0x27b   :  { %645 = vmatprep.subr.mxu1 %v535_v48 }
 0x27c   :  { %646 = vmatpush1.msra.mxu1 %v534_v42 }
 0x27d   :  { %1434 = vmatmul.mubr.msk.f32.vlgmr.msra.gmra.mrb[2].mxu1 %vm254_vm8, %v404_v15  ;;  %1433 = vmatmul.mubr.msk.f32.gmra.mrb[4].mxu0 %vm254_vm8, %v405_v32 }
 0x27e   :  { %699 = vmatprep.mubr.f32.mxu1 %v1824_v4  ;;  %958 = vmatprep.mubr.f32.mxu0 %v1824_v4 }
 0x280   :  { %v539_v34 = vpop.permute.xlu0 %538 }
 0x281   :  { %1435 = vmatmul.mubr.msk.f32.gmra.mrb[4].mxu1 %vm254_vm8, %v405_v32 }
 0x282   :  { %1029 = vmatprep.mubr.f32.mxu1 %v1824_v4 }
 0x34c   :  { %v618_v47 = vpop.f32.mrb[2].mxu0 }
 0x34d   :  { %v619_v39 = vadd.f32 %v618_v47, %v539_v34  ;;  %v620_v16 = vpop.f32.mrb[3].mxu0 }
 0x34e   :  { %v621_v43 = vadd.f32 %v620_v16, %v539_v34 }
 0x34f   :  { %v1436_v57 = vmul.f32 -1.442695, %v619_v39 }
 0x350   :  { %v1437_v30 = vmul.f32 -1.442695, %v621_v43  ;;  %v695_v52 = vpop.f32.mrb[2].mxu1  ;;  %v624_v61 = vpop.f32.mrb[4].mxu0 }
 0x351   :  { %1612 = vpow2.f32 %v1436_v57  ;;  %v696_v22 = vadd.f32 %v695_v52, %v539_v34  ;;  %v697_v38 = vpop.f32.mrb[3].mxu1  ;;  %v626_v44 = vpop.f32.mrb[5].mxu0 }
 0x352   :  { %1614 = vpow2.f32 %v1437_v30  ;;  %v698_v26 = vadd.f32 %v697_v38, %v539_v34 }
 0x353   :  { %v1438_v9 = vmul.f32 -1.442695, %v696_v22 }
 0x354   :  { %v1439_v31 = vmul.f32 -1.442695, %v698_v26  ;;  %v701_v15 = vpop.f32.mrb[4].mxu1 }
 0x355   :  { %1616 = vpow2.f32 %v1438_v9  ;;  %v703_v40 = vpop.f32.mrb[5].mxu1 }
 0x356   :  { %1618 = vpow2.f32 %v1439_v31 }
 0x35b   :  { %v1613_v25 = vpop.eup %1612 }
 0x35c   :  { %v1615_v41 = vpop.eup %1614  ;;  %v718_v42 = vadd.f32 1.0, %v1613_v25 }
 0x35d   :  { %v719_v48 = vadd.f32 1.0, %v1615_v41 }
 0x35e   :  { %1620 = vrcp.f32 %v718_v42 }
 0x35f   :  { %v1617_v32 = vpop.eup %1616  ;;  %1622 = vrcp.f32 %v719_v48 }
 0x360   :  { %v1619_v47 = vpop.eup %1618  ;;  %v720_v39 = vadd.f32 1.0, %v1617_v32 }
 0x361   :  { %v721_v16 = vadd.f32 1.0, %v1619_v47 }
 0x362   :  { %1624 = vrcp.f32 %v720_v39  ;;  %v544_v39 = vpop.permute.xlu1 %543 }
 0x363   :  { %1626 = vrcp.f32 %v721_v16  ;;  %v625_v16 = vadd.f32 %v624_v61, %v544_v39 }
 0x368   :  { %v1621_v43 = vpop.eup %1620 }
 0x369   :  { %v1623_v34 = vpop.eup %1622  ;;  %v1440_v57 = vadd.f32 -0.5, %v1621_v43 }
 0x36a   :  { %v1441_v30 = vadd.f32 -0.5, %v1623_v34  ;;  %v627_v34 = vadd.f32 %v626_v44, %v544_v39  ;;  %v704_v44 = vadd.f32 %v703_v40, %v544_v39 }
 0x36b   :  { %v734_v52 = vmul.f32 2.0, %v1440_v57 }
 0x36c   :  { %v1625_v22 = vpop.eup %1624  ;;  %v735_v38 = vmul.f32 2.0, %v1441_v30 }
 0x36d   :  { %v1627_v26 = vpop.eup %1626  ;;  %v738_v9 = vmul.f32 1.442695, %v734_v52  ;;  %v1442_v31 = vadd.f32 -0.5, %v1625_v22 }
 0x36e   :  { %v740_v25 = vmul.f32 1.442695, %v735_v38  ;;  %v1443_v41 = vadd.f32 -0.5, %v1627_v26 }
 0x36f   :  { %1628 = vpow2.f32 %v738_v9  ;;  %v736_v42 = vmul.f32 2.0, %v1442_v31 }
 0x370   :  { %1630 = vpow2.f32 %v740_v25  ;;  %v737_v48 = vmul.f32 2.0, %v1443_v41  ;;  %v702_v25 = vadd.f32 %v701_v15, %v544_v39 }
 0x371   :  { %v742_v32 = vmul.f32 1.442695, %v736_v42 }
 0x372   :  { %v744_v47 = vmul.f32 1.442695, %v737_v48 }
 0x373   :  { %1632 = vpow2.f32 %v742_v32 }
 0x374   :  { %1634 = vpow2.f32 %v744_v47 }
 0x379   :  { %v1629_v43 = vpop.eup %1628 }
 0x37a   :  { %v1631_v57 = vpop.eup %1630  ;;  %v746_v30 = vmul.f32 %v1629_v43, %v1919_v1 }
 0x37b   :  { %v747_v52 = vmul.f32 %v1631_v57, %v1927_v3 }
 0x37c   :  { %v2378_v22 = vadd.f32 %v746_v30, %v625_v16 }
 0x37d   :  { %v1633_v38 = vpop.eup %1632  ;;  %v2380_v26 = vadd.f32 %v747_v52, %v627_v34 }
 0x37e   :  { %v1635_v9 = vpop.eup %1634  ;;  %v748_v31 = vmul.f32 %v1633_v38, %v1917_v0  ;;  %758 = vrot.lane.b32.xlu0 %v2378_v22, %s1817_s21  ;;  %v1444_v0 = vld [vmem:[%s2757_s4 + $0x8] sm:$0xff] }
 0x37f   :  { %v749_v61 = vmul.f32 %v1635_v9, %v1925_v2  ;;  %760 = vrot.lane.b32.xlu1 %v2380_v26, %s1817_s21 }
 0x380   :  { %v2388_v1 = vadd.f32 %v748_v31, %v702_v25 }
 0x381   :  { %v2390_v3 = vadd.f32 %v749_v61, %v704_v44 }
 0x382   :  { %762 = vrot.lane.b32.xlu0 %v2388_v1, %s1817_s21 }
 0x383   :  { %764 = vrot.lane.b32.xlu1 %v2390_v3, %s1817_s21 }
 0x386   :  { %774 = vrot.lane.b32.xlu0 %v2378_v22, %s1818_s3 }
 0x387   :  { %776 = vrot.lane.b32.xlu1 %v2380_v26, %s1818_s3 }
 0x38a   :  { %778 = vrot.lane.b32.xlu0 %v2388_v1, %s1818_s3 }
 0x38b   :  { %780 = vrot.lane.b32.xlu1 %v2390_v3, %s1818_s3 }
 0x38e   :  { %790 = vrot.lane.b32.xlu0 %v2378_v22, %s1819_s22 }
 0x38f   :  { %792 = vrot.lane.b32.xlu1 %v2380_v26, %s1819_s22 }
 0x392   :  { %794 = vrot.lane.b32.xlu0 %v2388_v1, %s1819_s22 }
 0x393   :  { %796 = vrot.lane.b32.xlu1 %v2390_v3, %s1819_s22 }
 0x396   :  { %806 = vrot.lane.b32.xlu0 %v2378_v22, %s1820_s23 }
 0x397   :  { %808 = vrot.lane.b32.xlu1 %v2380_v26, %s1820_s23 }
 0x39a   :  { %810 = vrot.lane.b32.xlu0 %v2388_v1, %s1820_s23 }
 0x39b   :  { %812 = vrot.lane.b32.xlu1 %v2390_v3, %s1820_s23 }
 0x39e   :  { %822 = vrot.lane.b32.xlu0 %v2378_v22, %s1821_s24 }
 0x39f   :  { %824 = vrot.lane.b32.xlu1 %v2380_v26, %s1821_s24 }
 0x3a2   :  { %826 = vrot.lane.b32.xlu0 %v2388_v1, %s1821_s24 }
 0x3a3   :  { %828 = vrot.lane.b32.xlu1 %v2390_v3, %s1821_s24 }
 0x3a6   :  { %838 = vrot.lane.b32.xlu0 %v2378_v22, %s1822_s25 }
 0x3a7   :  { %840 = vrot.lane.b32.xlu1 %v2380_v26, %s1822_s25 }
 0x3aa   :  { %842 = vrot.lane.b32.xlu0 %v2388_v1, %s1822_s25 }
 0x3ab   :  { %844 = vrot.lane.b32.xlu1 %v2390_v3, %s1822_s25 }
 0x3ae   :  { %854 = vrot.lane.b32.xlu0 %v2378_v22, %s1823_s26 }
 0x3af   :  { %856 = vrot.lane.b32.xlu1 %v2380_v26, %s1823_s26 }
 0x3b2   :  { %858 = vrot.lane.b32.xlu0 %v2388_v1, %s1823_s26 }
 0x3b3   :  { %860 = vrot.lane.b32.xlu1 %v2390_v3, %s1823_s26 }
 0x3b6   :  { %870 = vrot.lane.b32.xlu0 %v2378_v22, %s1826_s2 }
 0x3b7   :  { %872 = vrot.lane.b32.xlu1 %v2380_v26, %s1826_s2 }
 0x3ba   :  { %874 = vrot.lane.b32.xlu0 %v2388_v1, %s1826_s2 }
 0x3bb   :  { %876 = vrot.lane.b32.xlu1 %v2390_v3, %s1826_s2 }
 0x3be   :  { %888 = vperm.xlu0 %1610, %v1444_v0  }
 0x3f0   :  { %v759_v2 = vpop.permute.xlu0 %758 }
 0x3f1   :  { %v761_v15 = vpop.permute.xlu1 %760 }
 0x3f2   :  { %v768_v42 = vsel %vm121_vm0, %v759_v2, %v761_v15 }
 0x3f3   :  { %v771_v39 = vmul.f32 %v768_v42, %v1998_v13 }
 0x3f4   :  { %v763_v40 = vpop.permute.xlu0 %762 }
 0x3f5   :  { %v765_v41 = vpop.permute.xlu1 %764  ;;  %v767_v30 = vsel %vm121_vm0, %v761_v15, %v763_v40 }
 0x3f6   :  { %v766_v43 = vsel %vm121_vm0, %v763_v40, %v765_v41  ;;  %v769_v34 = vsel %vm121_vm0, %v765_v41, %v759_v2  ;;  %v772_v2 = vmul.f32 %v767_v30, %v2022_v28 }
 0x3f7   :  { %v770_v25 = vmul.f32 %v769_v34, %v2008_v20  ;;  %v773_v61 = vmul.f32 %v766_v43, %v2014_v24 }
 0x3f8   :  { %v775_v48 = vpop.permute.xlu0 %774 }
 0x3f9   :  { %v777_v32 = vpop.permute.xlu1 %776 }
 0x3fa   :  { %v784_v47 = vsel %vm138_vm1, %v775_v48, %v777_v32 }
 0x3fb   :  { %v787_v16 = vmul.f32 %v784_v47, %v2000_v14 }
 0x3fc   :  { %v779_v57 = vpop.permute.xlu0 %778 }
 0x3fd   :  { %v783_v52 = vsel %vm138_vm1, %v777_v32, %v779_v57  ;;  %v781_v38 = vpop.permute.xlu1 %780  ;;  %v1527_v9 = vpack.c.bf16 %v787_v16, %v771_v39 }
 0x3fe   :  { %v788_v31 = vmul.f32 %v783_v52, %v2024_v29  ;;  %v782_v13 = vsel %vm138_vm1, %v779_v57, %v781_v38  ;;  %v785_v14 = vsel %vm138_vm1, %v781_v38, %v775_v48 }
 0x3ff   :  { %v786_v44 = vmul.f32 %v785_v14, %v2012_v23  ;;  %v789_v0 = vmul.f32 %v782_v13, %v2020_v27  ;;  %1528 = vmatprep.subr.bf16.mxu0 %v1527_v9 }
 0x400   :  { %v791_v15 = vpop.permute.xlu0 %790  ;;  %v1545_v42 = vpack.c.bf16 %v788_v31, %v772_v2 }
 0x401   :  { %v1529_v40 = vpack.c.bf16 %v786_v44, %v770_v25  ;;  %v793_v29 = vpop.permute.xlu1 %792  ;;  %v1543_v41 = vpack.c.bf16 %v789_v0, %v773_v61 }
 0x402   :  { %v800_v20 = vsel %vm155_vm2, %v791_v15, %v793_v29 }
 0x403   :  { %1530 = vmatpush1.bf16.msra.mxu0 %v1529_v40  ;;  %1544 = vmatprep.subr.bf16.mxu1 %v1543_v41  ;;  %v803_v28 = vmul.f32 %v800_v20, %v2040_v49 }
 0x404   :  { %1546 = vmatpush1.bf16.msra.mxu1 %v1545_v42  ;;  %v795_v48 = vpop.permute.xlu0 %794 }
 0x405   :  { %v797_v32 = vpop.permute.xlu1 %796  ;;  %v799_v34 = vsel %vm155_vm2, %v793_v29, %v795_v48 }
 0x406   :  { %v798_v39 = vsel %vm155_vm2, %v795_v48, %v797_v32  ;;  %v801_v16 = vsel %vm155_vm2, %v797_v32, %v791_v15  ;;  %v804_v25 = vmul.f32 %v799_v34, %v2053_v58 }
 0x407   :  { %v802_v9 = vmul.f32 %v801_v16, %v2046_v54  ;;  %v805_v31 = vmul.f32 %v798_v39, %v2055_v59 }
 0x408   :  { %v807_v24 = vpop.permute.xlu0 %806 }
 0x409   :  { %v809_v23 = vpop.permute.xlu1 %808 }
 0x40a   :  { %v816_v27 = vsel %vm172_vm3, %v807_v24, %v809_v23 }
 0x40b   :  { %v819_v47 = vmul.f32 %v816_v27, %v2044_v51 }
 0x40c   :  { %v811_v43 = vpop.permute.xlu0 %810 }
 0x40d   :  { %v815_v57 = vsel %vm172_vm3, %v809_v23, %v811_v43  ;;  %v813_v30 = vpop.permute.xlu1 %812  ;;  %v1531_v52 = vpack.c.bf16 %v819_v47, %v803_v28 }
 0x40e   :  { %v820_v38 = vmul.f32 %v815_v57, %v2064_v5  ;;  %v814_v49 = vsel %vm172_vm3, %v811_v43, %v813_v30  ;;  %v817_v51 = vsel %vm172_vm3, %v813_v30, %v807_v24 }
 0x40f   :  { %v818_v13 = vmul.f32 %v817_v51, %v2062_v63  ;;  %v821_v14 = vmul.f32 %v814_v49, %v2066_v6  ;;  %1532 = vmatprep.subr.bf16.mxu0 %v1531_v52 }
 0x410   :  { %v823_v61 = vpop.permute.xlu0 %822  ;;  %v1549_v2 = vpack.c.bf16 %v820_v38, %v804_v25 }
 0x411   :  { %v1533_v44 = vpack.c.bf16 %v818_v13, %v802_v9  ;;  %v825_v5 = vpop.permute.xlu1 %824  ;;  %v1547_v0 = vpack.c.bf16 %v821_v14, %v805_v31 }
 0x412   :  { %v832_v15 = vsel %vm189_vm4, %v823_v61, %v825_v5 }
 0x413   :  { %1534 = vmatpush1.bf16.msra.mxu0 %v1533_v44  ;;  %1548 = vmatprep.subr.bf16.mxu1 %v1547_v0  ;;  %v834_v59 = vmul.f32 %v832_v15, %v2081_v33 }
 0x414   :  { %1550 = vmatpush1.bf16.msra.mxu1 %v1549_v2  ;;  %v827_v54 = vpop.permute.xlu0 %826 }
 0x415   :  { %v831_v63 = vsel %vm189_vm4, %v825_v5, %v827_v54  ;;  %v829_v6 = vpop.permute.xlu1 %828  ;;  %v1537_v33 = vpack.c.bf16 %v834_v59, %v2378_v22 }
 0x416   :  { %v835_v58 = vmul.f32 %v831_v63, %v2087_v36  ;;  %v830_v40 = vsel %vm189_vm4, %v827_v54, %v829_v6  ;;  %v833_v29 = vsel %vm189_vm4, %v829_v6, %v823_v61  ;;  %v755_v6 = vld [vmem:[#allocation7 + $0x8] sm:$0xff] }
 0x417   :  { %v836_v41 = vmul.f32 %v830_v40, %v2089_v37  ;;  %v837_v42 = vmul.f32 %v833_v29, %v2085_v35 }
 0x418   :  { %v839_v48 = vpop.permute.xlu0 %838  ;;  %v1535_v32 = vpack.c.bf16 %v835_v58, %v2380_v26 }
 0x419   :  { %v1553_v20 = vpack.c.bf16 %v836_v41, %v2388_v1  ;;  %v841_v24 = vpop.permute.xlu1 %840  ;;  %v1551_v36 = vpack.c.bf16 %v837_v42, %v2390_v3 }
 0x41a   :  { %1536 = vmatprep.subr.bf16.mxu0 %v1535_v32  ;;  %v848_v35 = vsel %vm206_vm6, %v839_v48, %v841_v24 }
 0x41b   :  { %1538 = vmatpush1.bf16.msra.mxu0 %v1537_v33  ;;  %1552 = vmatprep.subr.bf16.mxu1 %v1551_v36  ;;  %v850_v57 = vmul.f32 %v848_v35, %v2129_v21  ;;  %v1660_v35 = vld [vmem:[#allocation2 + $0x8] sm:$0xff] }
 0x41c   :  { %1554 = vmatpush1.bf16.msra.mxu1 %v1553_v20  ;;  %v843_v23 = vpop.permute.xlu0 %842 }
 0x41d   :  { %v845_v27 = vpop.permute.xlu1 %844  ;;  %v847_v39 = vsel %vm206_vm6, %v841_v24, %v843_v23 }
 0x41e   :  { %v846_v16 = vsel %vm206_vm6, %v843_v23, %v845_v27  ;;  %v849_v43 = vsel %vm206_vm6, %v845_v27, %v839_v48  ;;  %v851_v49 = vmul.f32 %v847_v39, %v2111_v8  ;;  %v1661_v39 = vld [vmem:[#allocation2 + $0x28] sm:$0xff] }
 0x41f   :  { %v852_v13 = vmul.f32 %v846_v16, %v2115_v11  ;;  %v853_v21 = vmul.f32 %v849_v43, %v2107_v62 }
 0x420   :  { %v855_v28 = vpop.permute.xlu0 %854 }
 0x421   :  { %v857_v37 = vpop.permute.xlu1 %856 }
 0x422   :  { %v864_v47 = vsel %vm223_vm5, %v855_v28, %v857_v37 }
 0x423   :  { %v866_v30 = vmul.f32 %v864_v47, %v2117_v12 }
 0x424   :  { %v859_v34 = vpop.permute.xlu0 %858 }
 0x425   :  { %v863_v52 = vsel %vm223_vm5, %v857_v37, %v859_v34  ;;  %v861_v38 = vpop.permute.xlu1 %860  ;;  %v1541_v44 = vpack.c.bf16 %v866_v30, %v850_v57 }
 0x426   :  { %v867_v51 = vmul.f32 %v863_v52, %v2125_v18  ;;  %v862_v9 = vsel %vm223_vm5, %v859_v34, %v861_v38  ;;  %v865_v31 = vsel %vm223_vm5, %v861_v38, %v855_v28 }
 0x427   :  { %v868_v12 = vmul.f32 %v862_v9, %v2127_v19  ;;  %v869_v14 = vmul.f32 %v865_v31, %v2123_v17 }
 0x428   :  { %v871_v25 = vpop.permute.xlu0 %870  ;;  %v1539_v61 = vpack.c.bf16 %v867_v51, %v851_v49  ;;  %v1662_v51 = vld [vmem:[#allocation2 + $0x30] sm:$0xff] }
 0x429   :  { %v1557_v8 = vpack.c.bf16 %v868_v12, %v852_v13  ;;  %v873_v5 = vpop.permute.xlu1 %872  ;;  %v1555_v18 = vpack.c.bf16 %v869_v14, %v853_v21  ;;  %v1663_v21 = vld [vmem:[#allocation2] sm:$0xff]  ;;  %v1664_v14 = vld [vmem:[#allocation2 + $0x18] sm:$0xff] }
 0x42a   :  { %1540 = vmatprep.subr.bf16.mxu0 %v1539_v61  ;;  %v880_v0 = vsel %vm240_vm7, %v871_v25, %v873_v5  ;;  %v1665_v61 = vld [vmem:[#allocation2 + $0x20] sm:$0xff] }
 0x42b   :  { %1542 = vmatpush1.bf16.msra.mxu0 %v1541_v44  ;;  %1556 = vmatprep.subr.bf16.mxu1 %v1555_v18  ;;  %v882_v54 = vmul.f32 %v880_v0, %v2156_v7  ;;  %v1667_v18 = vld [vmem:[#allocation2 + $0x10] sm:$0xff] }
 0x42c   :  { %1558 = vmatpush1.bf16.msra.mxu1 %v1557_v8  ;;  %v875_v11 = vpop.permute.xlu0 %874  ;;  %v1666_v8 = vld [vmem:[#allocation2 + $0x38] sm:$0xff] }
 0x42d   :  { %v879_v62 = vsel %vm240_vm7, %v873_v5, %v875_v11  ;;  %v877_v19 = vpop.permute.xlu1 %876 }
 0x42e   :  { %v883_v17 = vmul.f32 %v879_v62, %v2148_v53  ;;  %v878_v2 = vsel %vm240_vm7, %v875_v11, %v877_v19  ;;  %v881_v15 = vsel %vm240_vm7, %v877_v19, %v871_v25 }
 0x42f   :  { %v884_v59 = vmul.f32 %v878_v2, %v2152_v56  ;;  %v885_v63 = vmul.f32 %v881_v15, %v2150_v55 }
 0x430   :  { %910 = vmatprep.subr.mxu0 %v883_v17 }
 0x431   :  { %911 = vmatpush1.msra.mxu0 %v882_v54  ;;  %981 = vmatprep.subr.mxu1 %v885_v63 }
 0x432   :  { %1445 = vmatmul.mubr.msk.f32.vlgmr.msra.gmra.mrb[6].mxu0 %vm254_vm8, %v755_v6  ;;  %982 = vmatpush1.msra.mxu1 %v884_v59 }
 0x433   :  { %1446 = vmatmul.mubr.msk.f32.vlgmr.msra.gmra.mrb[6].mxu1 %vm254_vm8, %v755_v6  ;;  %1254 = vmatprep.mubr.f32.mxu0 %v1824_v4 }
 0x434   :  { %1331 = vmatprep.mubr.f32.mxu1 %v1824_v4 }
 0x43d   :  { %v889_v53 = vpop.permute.xlu0 %888 }
 0x505   :  { %v960_v58 = vpop.f32.mrb[6].mxu0 }
 0x506   :  { %v961_v7 = vadd.f32 %v960_v58, %v889_v53  ;;  %v962_v40 = vpop.f32.mrb[7].mxu0  ;;  %v1031_v56 = vpop.f32.mrb[6].mxu1  ;;  %v1668_v58 = vld [vmem:[#allocation2 + $0x48] sm:$0xff] }
 0x507   :  { %v963_v29 = vadd.f32 %v962_v40, %v889_v53  ;;  %v1032_v55 = vadd.f32 %v1031_v56, %v889_v53  ;;  %v1033_v41 = vpop.f32.mrb[7].mxu1  ;;  %v1669_v40 = vld [vmem:[#allocation2 + $0x68] sm:$0xff] }
 0x508   :  { %v2560_v42 = vadd.f32 %v961_v7, %v2178_v45  ;;  %v1034_v48 = vadd.f32 %v1033_v41, %v889_v53  ;;  %v1449_v45 = vld [vmem:[%s2759_s6 + $0x10] sm:$0xff] }
 0x509   :  { %v2563_v32 = vadd.f32 %v963_v29, %v2189_v50  ;;  %v2566_v33 = vadd.f32 %v1032_v55, %v2180_v46  ;;  %v1450_v46 = vld [vmem:[%s2759_s6 + $0x18] sm:$0xff] }
 0x50a   :  { %1392 = vst [vmem:[#allocation8] sm:$0xff] %v2560_v42  ;;  %v2570_v20 = vadd.f32 %v1034_v48, %v2198_v60  ;;  %1046 = vrot.lane.b32.xlu1 %v2560_v42, %s1817_s21 }
 0x50b   :  { %1393 = vst [vmem:[#allocation8 + $0x8] sm:$0xff] %v2563_v32  ;;  %1394 = vst [vmem:[#allocation8 + $0x10] sm:$0xff] %v2566_v33  ;;  %1048 = vrot.lane.b32.xlu0 %v2563_v32, %s1817_s21 }
 0x50c   :  { %1395 = vst [vmem:[#allocation8 + $0x18] sm:$0xff] %v2570_v20 }
 0x50e   :  { %1050 = vrot.lane.b32.xlu1 %v2566_v33, %s1817_s21 }
 0x50f   :  { %1052 = vrot.lane.b32.xlu0 %v2570_v20, %s1817_s21 }
 0x512   :  { %1062 = vrot.lane.b32.xlu1 %v2560_v42, %s1818_s3 }
 0x513   :  { %1064 = vrot.lane.b32.xlu0 %v2563_v32, %s1818_s3 }
 0x516   :  { %1066 = vrot.lane.b32.xlu1 %v2566_v33, %s1818_s3 }
 0x517   :  { %1068 = vrot.lane.b32.xlu0 %v2570_v20, %s1818_s3 }
 0x51a   :  { %1078 = vrot.lane.b32.xlu1 %v2560_v42, %s1819_s22 }
 0x51b   :  { %1080 = vrot.lane.b32.xlu0 %v2563_v32, %s1819_s22 }
 0x51e   :  { %1082 = vrot.lane.b32.xlu1 %v2566_v33, %s1819_s22 }
 0x51f   :  { %1084 = vrot.lane.b32.xlu0 %v2570_v20, %s1819_s22 }
 0x522   :  { %1094 = vrot.lane.b32.xlu1 %v2560_v42, %s1820_s23 }
 0x523   :  { %1096 = vrot.lane.b32.xlu0 %v2563_v32, %s1820_s23 }
 0x526   :  { %1098 = vrot.lane.b32.xlu1 %v2566_v33, %s1820_s23 }
 0x527   :  { %1100 = vrot.lane.b32.xlu0 %v2570_v20, %s1820_s23 }
 0x52a   :  { %1110 = vrot.lane.b32.xlu1 %v2560_v42, %s1821_s24 }
 0x52b   :  { %1112 = vrot.lane.b32.xlu0 %v2563_v32, %s1821_s24 }
 0x52e   :  { %1114 = vrot.lane.b32.xlu1 %v2566_v33, %s1821_s24 }
 0x52f   :  { %1116 = vrot.lane.b32.xlu0 %v2570_v20, %s1821_s24 }
 0x532   :  { %1126 = vrot.lane.b32.xlu1 %v2560_v42, %s1822_s25 }
 0x533   :  { %1128 = vrot.lane.b32.xlu0 %v2563_v32, %s1822_s25 }
 0x536   :  { %1130 = vrot.lane.b32.xlu1 %v2566_v33, %s1822_s25 }
 0x537   :  { %1132 = vrot.lane.b32.xlu0 %v2570_v20, %s1822_s25 }
 0x53a   :  { %1142 = vrot.lane.b32.xlu1 %v2560_v42, %s1823_s26 }
 0x53b   :  { %1144 = vrot.lane.b32.xlu0 %v2563_v32, %s1823_s26 }
 0x53e   :  { %1146 = vrot.lane.b32.xlu1 %v2566_v33, %s1823_s26 }
 0x53f   :  { %1148 = vrot.lane.b32.xlu0 %v2570_v20, %s1823_s26  ;;  %s1827_s26 = smov [#allocation8]  }
 0x542   :  { %1158 = vrot.lane.b32.xlu1 %v2560_v42, %s1826_s2 }
 0x543   :  { %1160 = vrot.lane.b32.xlu0 %v2563_v32, %s1826_s2 }
 0x546   :  { %1162 = vrot.lane.b32.xlu1 %v2566_v33, %s1826_s2 }
 0x547   :  { %1164 = vrot.lane.b32.xlu0 %v2570_v20, %s1826_s2  ;;  %s1406_s2 = sshll.u32 %s1827_s26, 4  ;;  %s1407_s2 = int_to_ptr.vmem [resolvable:$true] %s1406_s2 }
 0x548   :  { %s1758_s29 = scalar_lea.vmem %s1407_s2, 512  ;;  %p1763_p11 = scmp.lt.s32.totalorder %s1407_s2, %s1407_s2 }
 0x549   :  { %p1759_p10 = scmp.ne.s32.totalorder %s1407_s2, %s1758_s29  ;;  %p1764_p12 = scmp.lt.s32.totalorder %s1758_s29, %s1758_s29 }
 0x54a   :  { %1176 = vperm.xlu1 %1611, %v1449_v45  }
 0x54b   :  { %1181 = vperm.xlu0 %1610, %v1450_v46   ;;  %p1765_p13 = por %p1764_p12, %p1763_p11 }
 0x54d   :  { %p1766_p0 = pnand %p1765_p13, %p1759_p10 }
 0x57c   :  { %v1047_v50 = vpop.permute.xlu1 %1046 }
 0x57d   :  { %v1049_v60 = vpop.permute.xlu0 %1048 }
 0x57e   :  { %v1056_v23 = vsel %vm121_vm0, %v1047_v50, %v1049_v60 }
 0x57f   :  { %v1059_v47 = vmul.f32 %v1660_v35, %v1056_v23 }
 0x580   :  { %v1051_v24 = vpop.permute.xlu1 %1050 }
 0x581   :  { %v1053_v36 = vpop.permute.xlu0 %1052  ;;  %v1055_v30 = vsel %vm121_vm0, %v1049_v60, %v1051_v24  ;;  %v1670_v60 = vld [vmem:[#allocation2 + $0x70] sm:$0xff] }
 0x582   :  { %v1054_v43 = vsel %vm121_vm0, %v1051_v24, %v1053_v36  ;;  %v1057_v34 = vsel %vm121_vm0, %v1053_v36, %v1047_v50  ;;  %v1060_v0 = vmul.f32 %v1667_v18, %v1055_v30 }
 0x583   :  { %v1058_v12 = vmul.f32 %v1663_v21, %v1057_v34  ;;  %v1061_v25 = vmul.f32 %v1664_v14, %v1054_v43  ;;  %v1675_v34 = vld [vmem:[#allocation2 + $0x50] sm:$0xff] }
 0x584   :  { %v1063_v27 = vpop.permute.xlu1 %1062 }
 0x585   :  { %v1065_v28 = vpop.permute.xlu0 %1064 }
 0x586   :  { %v1072_v37 = vsel %vm138_vm1, %v1063_v27, %v1065_v28 }
 0x587   :  { %v1075_v16 = vmul.f32 %v1661_v39, %v1072_v37  ;;  %v1672_v37 = vld [vmem:[#allocation2 + $0x58] sm:$0xff] }
 0x588   :  { %v1067_v57 = vpop.permute.xlu1 %1066 }
 0x589   :  { %v1071_v52 = vsel %vm138_vm1, %v1065_v28, %v1067_v57  ;;  %v1069_v38 = vpop.permute.xlu0 %1068  ;;  %v1559_v49 = vpack.c.bf16 %v1075_v16, %v1059_v47  ;;  %v1673_v47 = vld [vmem:[#allocation2 + $0x60] sm:$0xff]  ;;  %v1674_v16 = vld [vmem:[#allocation2 + $0x78] sm:$0xff] }
 0x58a   :  { %v1076_v9 = vmul.f32 %v1662_v51, %v1071_v52  ;;  %v1070_v31 = vsel %vm138_vm1, %v1067_v57, %v1069_v38  ;;  %v1073_v13 = vsel %vm138_vm1, %v1069_v38, %v1063_v27  ;;  %v1671_v27 = vld [vmem:[#allocation2 + $0x40] sm:$0xff] }
 0x58b   :  { %v1074_v44 = vmul.f32 %v1665_v61, %v1073_v13  ;;  %v1077_v5 = vmul.f32 %v1666_v8, %v1070_v31  ;;  %1560 = vmatprep.subr.bf16.mxu0 %v1559_v49  ;;  %v1676_v13 = vld [vmem:[#allocation2 + $0xa0] sm:$0xff] }
 0x58c   :  { %v1079_v11 = vpop.permute.xlu1 %1078  ;;  %v1577_v2 = vpack.c.bf16 %v1076_v9, %v1060_v0  ;;  %v1679_v0 = vld [vmem:[#allocation2 + $0xb8] sm:$0xff] }
 0x58d   :  { %v1561_v62 = vpack.c.bf16 %v1074_v44, %v1058_v12  ;;  %v1081_v19 = vpop.permute.xlu0 %1080  ;;  %v1575_v17 = vpack.c.bf16 %v1077_v5, %v1061_v25  ;;  %v1677_v25 = vld [vmem:[#allocation2 + $0xa8] sm:$0xff]  ;;  %v1678_v5 = vld [vmem:[#allocation2 + $0xb0] sm:$0xff] }
 0x58e   :  { %v1088_v59 = vsel %vm155_vm2, %v1079_v11, %v1081_v19 }
 0x58f   :  { %1562 = vmatpush1.bf16.msra.mxu0 %v1561_v62  ;;  %1576 = vmatprep.subr.bf16.mxu1 %v1575_v17  ;;  %v1091_v7 = vmul.f32 %v1668_v58, %v1088_v59 }
 0x590   :  { %1578 = vmatpush1.bf16.msra.mxu1 %v1577_v2  ;;  %v1083_v15 = vpop.permute.xlu1 %1082 }
 0x591   :  { %v1085_v54 = vpop.permute.xlu0 %1084  ;;  %v1087_v48 = vsel %vm155_vm2, %v1081_v19, %v1083_v15 }
 0x592   :  { %v1086_v29 = vsel %vm155_vm2, %v1083_v15, %v1085_v54  ;;  %v1089_v55 = vsel %vm155_vm2, %v1085_v54, %v1079_v11  ;;  %v1092_v57 = vmul.f32 %v1675_v34, %v1087_v48 }
 0x593   :  { %v1090_v28 = vmul.f32 %v1671_v27, %v1089_v55  ;;  %v1093_v35 = vmul.f32 %v1672_v37, %v1086_v29  ;;  %v1681_v29 = vld [vmem:[#allocation2 + $0xe0] sm:$0xff] }
 0x594   :  { %v1095_v63 = vpop.permute.xlu1 %1094 }
 0x595   :  { %v1097_v6 = vpop.permute.xlu0 %1096 }
 0x596   :  { %v1104_v53 = vsel %vm172_vm3, %v1095_v63, %v1097_v6 }
 0x597   :  { %v1107_v56 = vmul.f32 %v1669_v40, %v1104_v53  ;;  %v1680_v40 = vld [vmem:[#allocation2 + $0xc0] sm:$0xff] }
 0x598   :  { %v1099_v41 = vpop.permute.xlu1 %1098 }
 0x599   :  { %v1103_v45 = vsel %vm172_vm3, %v1097_v6, %v1099_v41  ;;  %v1101_v46 = vpop.permute.xlu0 %1100  ;;  %v1563_v50 = vpack.c.bf16 %v1107_v56, %v1091_v7 }
 0x59a   :  { %v1108_v24 = vmul.f32 %v1670_v60, %v1103_v45  ;;  %v1102_v36 = vsel %vm172_vm3, %v1099_v41, %v1101_v46  ;;  %v1105_v23 = vsel %vm172_vm3, %v1101_v46, %v1095_v63  ;;  %v1682_v45 = vld [vmem:[#allocation2 + $0xc8] sm:$0xff] }
 0x59b   :  { %v1106_v39 = vmul.f32 %v1673_v47, %v1105_v23  ;;  %v1109_v43 = vmul.f32 %v1674_v16, %v1102_v36  ;;  %1564 = vmatprep.subr.bf16.mxu0 %v1563_v50  ;;  %v1683_v50 = vld [vmem:[#allocation2 + $0xe8] sm:$0xff]  ;;  %v1684_v23 = vld [vmem:[#allocation2 + $0xd0] sm:$0xff] }
 0x59c   :  { %v1111_v30 = vpop.permute.xlu1 %1110  ;;  %v1581_v51 = vpack.c.bf16 %v1108_v24, %v1092_v57 }
 0x59d   :  { %v1565_v52 = vpack.c.bf16 %v1106_v39, %v1090_v28  ;;  %v1113_v38 = vpop.permute.xlu0 %1112  ;;  %v1579_v49 = vpack.c.bf16 %v1109_v43, %v1093_v35  ;;  %v1685_v28 = vld [vmem:[#allocation2 + $0xd8] sm:$0xff]  ;;  %v1686_v35 = vld [vmem:[#allocation2 + $0xf0] sm:$0xff] }
 0x59e   :  { %v1120_v9 = vsel %vm189_vm4, %v1111_v30, %v1113_v38  ;;  %v1687_v39 = vld [vmem:[#allocation2 + $0xf8] sm:$0xff] }
 0x59f   :  { %1566 = vmatpush1.bf16.msra.mxu0 %v1565_v52  ;;  %1580 = vmatprep.subr.bf16.mxu1 %v1579_v49  ;;  %v1122_v21 = vmul.f32 %v1676_v13, %v1120_v9  ;;  %v1688_v13 = vld [vmem:[#allocation2 + $0x108] sm:$0xff] }
 0x5a0   :  { %1582 = vmatpush1.bf16.msra.mxu1 %v1581_v51  ;;  %v1115_v31 = vpop.permute.xlu1 %1114 }
 0x5a1   :  { %v1119_v12 = vsel %vm189_vm4, %v1113_v38, %v1115_v31  ;;  %v1117_v14 = vpop.permute.xlu0 %1116  ;;  %v1569_v17 = vpack.c.bf16 %v1122_v21, %v2560_v42 }
 0x5a2   :  { %v1123_v61 = vmul.f32 %v1677_v25, %v1119_v12  ;;  %v1118_v44 = vsel %vm189_vm4, %v1115_v31, %v1117_v14  ;;  %v1121_v8 = vsel %vm189_vm4, %v1117_v14, %v1111_v30  ;;  %v1689_v25 = vld [vmem:[#allocation2 + $0x100] sm:$0xff] }
 0x5a3   :  { %v1124_v18 = vmul.f32 %v1678_v5, %v1118_v44  ;;  %v1125_v11 = vmul.f32 %v1679_v0, %v1121_v8  ;;  %v1690_v44 = vld [vmem:[#allocation2 + $0x110] sm:$0xff]  ;;  %v1691_v5 = vld [vmem:[#allocation2 + $0x118] sm:$0xff] }
 0x5a4   :  { %v1127_v62 = vpop.permute.xlu1 %1126  ;;  %v1567_v19 = vpack.c.bf16 %v1123_v61, %v2563_v32  ;;  %v1447_v0 = vld [vmem:[%s2758_s5 + $0x10] sm:$0xff] }
 0x5a5   :  { %v1585_v2 = vpack.c.bf16 %v1124_v18, %v2566_v33  ;;  %v1129_v15 = vpop.permute.xlu0 %1128  ;;  %v1583_v54 = vpack.c.bf16 %v1125_v11, %v2570_v20 }
 0x5a6   :  { %1568 = vmatprep.subr.bf16.mxu0 %v1567_v19  ;;  %v1136_v58 = vsel %vm206_vm6, %v1127_v62, %v1129_v15 }
 0x5a7   :  { %1570 = vmatpush1.bf16.msra.mxu0 %v1569_v17  ;;  %1584 = vmatprep.subr.bf16.mxu1 %v1583_v54  ;;  %v1138_v56 = vmul.f32 %v1680_v40, %v1136_v58 }
 0x5a8   :  { %1586 = vmatpush1.bf16.msra.mxu1 %v1585_v2  ;;  %v1131_v59 = vpop.permute.xlu1 %1130 }
 0x5a9   :  { %v1133_v63 = vpop.permute.xlu0 %1132  ;;  %v1135_v42 = vsel %vm206_vm6, %v1129_v15, %v1131_v59 }
 0x5aa   :  { %v1134_v33 = vsel %vm206_vm6, %v1131_v59, %v1133_v63  ;;  %v1137_v20 = vsel %vm206_vm6, %v1133_v63, %v1127_v62  ;;  %v1139_v46 = vmul.f32 %v1682_v45, %v1135_v42 }
 0x5ab   :  { %v1140_v27 = vmul.f32 %v1684_v23, %v1134_v33  ;;  %v1141_v37 = vmul.f32 %v1685_v28, %v1137_v20 }
 0x5ac   :  { %v1143_v6 = vpop.permute.xlu1 %1142 }
 0x5ad   :  { %v1145_v53 = vpop.permute.xlu0 %1144 }
 0x5ae   :  { %v1152_v32 = vsel %vm223_vm5, %v1143_v6, %v1145_v53 }
 0x5af   :  { %v1154_v55 = vmul.f32 %v1681_v29, %v1152_v32 }
 0x5b0   :  { %v1147_v7 = vpop.permute.xlu1 %1146 }
 0x5b1   :  { %v1151_v41 = vsel %vm223_vm5, %v1145_v53, %v1147_v7  ;;  %v1149_v48 = vpop.permute.xlu0 %1148  ;;  %v1573_v57 = vpack.c.bf16 %v1154_v55, %v1138_v56 }
 0x5b2   :  { %v1155_v60 = vmul.f32 %v1683_v50, %v1151_v41  ;;  %v1150_v24 = vsel %vm223_vm5, %v1147_v7, %v1149_v48  ;;  %v1153_v36 = vsel %vm223_vm5, %v1149_v48, %v1143_v6 }
 0x5b3   :  { %v1156_v47 = vmul.f32 %v1686_v35, %v1150_v24  ;;  %v1157_v16 = vmul.f32 %v1687_v39, %v1153_v36 }
 0x5b4   :  { %v1159_v43 = vpop.permute.xlu1 %1158  ;;  %v1571_v34 = vpack.c.bf16 %v1155_v60, %v1139_v46 }
 0x5b5   :  { %v1589_v30 = vpack.c.bf16 %v1156_v47, %v1140_v27  ;;  %v1161_v52 = vpop.permute.xlu0 %1160  ;;  %v1587_v38 = vpack.c.bf16 %v1157_v16, %v1141_v37 }
 0x5b6   :  { %1572 = vmatprep.subr.bf16.mxu0 %v1571_v34  ;;  %v1168_v49 = vsel %vm240_vm7, %v1159_v43, %v1161_v52 }
 0x5b7   :  { %1574 = vmatpush1.bf16.msra.mxu0 %v1573_v57  ;;  %1588 = vmatprep.subr.bf16.mxu1 %v1587_v38  ;;  %v1170_v61 = vmul.f32 %v1689_v25, %v1168_v49 }
 0x5b8   :  { %1590 = vmatpush1.bf16.msra.mxu1 %v1589_v30  ;;  %v1163_v51 = vpop.permute.xlu1 %1162 }
 0x5b9   :  { %v1167_v9 = vsel %vm240_vm7, %v1161_v52, %v1163_v51  ;;  %v1165_v31 = vpop.permute.xlu0 %1164 }
 0x5ba   :  { %v1171_v21 = vmul.f32 %v1688_v13, %v1167_v9  ;;  %v1166_v12 = vsel %vm240_vm7, %v1163_v51, %v1165_v31  ;;  %v1169_v14 = vsel %vm240_vm7, %v1165_v31, %v1159_v43 }
 0x5bb   :  { %v1172_v8 = vmul.f32 %v1690_v44, %v1166_v12  ;;  %v1173_v18 = vmul.f32 %v1691_v5, %v1169_v14 }
 0x5bc   :  { %1206 = vmatprep.subr.mxu0 %v1171_v21 }
 0x5bd   :  { %1207 = vmatpush1.msra.mxu0 %v1170_v61  ;;  %1283 = vmatprep.subr.mxu1 %v1173_v18 }
 0x5be   :  { %1451 = vmatmul.mubr.msk.f32.vlgmr.msra.gmra.mrb[8].mxu0 %vm254_vm8, %v1447_v0  ;;  %1284 = vmatpush1.msra.mxu1 %v1172_v8 }
 0x5bf   :  { %1453 = vmatmul.mubr.msk.f32.vlgmr.msra.gmra.mrb[8].mxu1 %vm254_vm8, %v1447_v0  ;;  %1260 = vmatprep.mubr.f32.mxu0 %v1824_v4 }
 0x5c0   :  { %1337 = vmatprep.mubr.f32.mxu1 %v1824_v4 }
 0x5c2   :  { %1452 = vmatmul.mubr.msk.f32.gmra.mrb[10].mxu0 %vm254_vm8, %v1448_v10 }
 0x5c3   :  { %1454 = vmatmul.mubr.msk.f32.gmra.mrb[10].mxu1 %vm254_vm8, %v1448_v10 }
 0x5c4   :  { %1769 = shalt.err (!%p1766_p0)
}
 0x5c5   :  { %s1770_s5 = scalar_lea.hbm %s2760_s7, 512 }
 0x5c6   :  { %p1771_p1 = scmp.ne.s32.totalorder %s2760_s7, %s1770_s5  ;;  %p1774_p2 = scmp.lt.u32.totalorder %s1770_s5, %s2760_s7 }
 0x5c8   :  { %p1776_p3 = pnand %p1774_p2, %p1771_p1 }
 0x5ca   :  { %1779 = shalt.err (!%p1776_p3)
}
 0x5cb   :  { %1409 = dma.vmem_to_hbm [thread:$0]  %s1407_s2, 512, %s2760_s7, [#allocation4]   ;;  %v1177_v4 = vpop.permute.xlu1 %1176  ;;  %v1182_v52 = vpop.permute.xlu0 %1181 }
 0x5cc   :  { %s1828_s7 = smov [#allocation9]  }
 0x5cd   :  { %s1416_s16 = sshll.u32 %s1828_s7, 4  ;;  %s1417_s16 = int_to_ptr.vmem [resolvable:$true] %s1416_s16 }
 0x5ce   :  { %s1780_s17 = scalar_lea.vmem %s1417_s16, 512  ;;  %p1785_p5 = scmp.lt.s32.totalorder %s1417_s16, %s1417_s16 }
 0x5cf   :  { %p1781_p4 = scmp.ne.s32.totalorder %s1417_s16, %s1780_s17  ;;  %p1786_p6 = scmp.lt.s32.totalorder %s1780_s17, %s1780_s17 }
 0x5d1   :  { %p1787_p7 = por %p1786_p6, %p1785_p5 }
 0x5d3   :  { %p1788_p8 = pnand %p1787_p7, %p1781_p4 }
 0x691   :  { %v1256_v11 = vpop.f32.mrb[8].mxu0 }
 0x692   :  { %v1257_v62 = vadd.f32 %v1256_v11, %v1177_v4  ;;  %v1258_v19 = vpop.f32.mrb[9].mxu0  ;;  %v1333_v17 = vpop.f32.mrb[8].mxu1 }
 0x693   :  { %v1259_v2 = vadd.f32 %v1258_v19, %v1177_v4  ;;  %v1334_v15 = vadd.f32 %v1333_v17, %v1177_v4  ;;  %v1335_v54 = vpop.f32.mrb[9].mxu1 }
 0x694   :  { %v1455_v59 = vmul.f32 -1.442695, %v1257_v62  ;;  %v1336_v63 = vadd.f32 %v1335_v54, %v1177_v4 }
 0x695   :  { %v1456_v6 = vmul.f32 -1.442695, %v1259_v2  ;;  %v1457_v53 = vmul.f32 -1.442695, %v1334_v15  ;;  %v1262_v58 = vpop.f32.mrb[10].mxu0 }
 0x696   :  { %1636 = vpow2.f32 %v1455_v59  ;;  %v1458_v32 = vmul.f32 -1.442695, %v1336_v63  ;;  %v1264_v42 = vpop.f32.mrb[11].mxu0  ;;  %v1339_v33 = vpop.f32.mrb[10].mxu1  ;;  %v1263_v49 = vadd.f32 %v1262_v58, %v1182_v52 }
 0x697   :  { %1638 = vpow2.f32 %v1456_v6  ;;  %v1341_v20 = vpop.f32.mrb[11].mxu1  ;;  %v1265_v31 = vadd.f32 %v1264_v42, %v1182_v52  ;;  %v1340_v14 = vadd.f32 %v1339_v33, %v1182_v52 }
 0x698   :  { %1640 = vpow2.f32 %v1457_v53  ;;  %v1342_v44 = vadd.f32 %v1341_v20, %v1182_v52 }
 0x699   :  { %1642 = vpow2.f32 %v1458_v32 }
 0x6a0   :  { %v1637_v7 = vpop.eup %1636 }
 0x6a1   :  { %v1639_v40 = vpop.eup %1638  ;;  %v1356_v56 = vadd.f32 1.0, %v1637_v7 }
 0x6a2   :  { %v1641_v29 = vpop.eup %1640  ;;  %v1357_v55 = vadd.f32 1.0, %v1639_v40 }
 0x6a3   :  { %v1643_v41 = vpop.eup %1642  ;;  %1644 = vrcp.f32 %v1356_v56  ;;  %v1358_v48 = vadd.f32 1.0, %v1641_v29 }
 0x6a4   :  { %1646 = vrcp.f32 %v1357_v55  ;;  %v1359_v45 = vadd.f32 1.0, %v1643_v41 }
 0x6a5   :  { %1648 = vrcp.f32 %v1358_v48 }
 0x6a6   :  { %1650 = vrcp.f32 %v1359_v45 }
 0x6ad   :  { %v1645_v46 = vpop.eup %1644 }
 0x6ae   :  { %v1647_v50 = vpop.eup %1646  ;;  %v1459_v60 = vadd.f32 -0.5, %v1645_v46 }
 0x6af   :  { %v1649_v24 = vpop.eup %1648  ;;  %v1460_v36 = vadd.f32 -0.5, %v1647_v50 }
 0x6b0   :  { %v1651_v23 = vpop.eup %1650  ;;  %v1372_v27 = vmul.f32 2.0, %v1459_v60  ;;  %v1461_v28 = vadd.f32 -0.5, %v1649_v24 }
 0x6b1   :  { %v1373_v37 = vmul.f32 2.0, %v1460_v36  ;;  %v1462_v35 = vadd.f32 -0.5, %v1651_v23 }
 0x6b2   :  { %v1376_v47 = vmul.f32 1.442695, %v1372_v27  ;;  %v1374_v39 = vmul.f32 2.0, %v1461_v28 }
 0x6b3   :  { %v1378_v16 = vmul.f32 1.442695, %v1373_v37  ;;  %v1375_v43 = vmul.f32 2.0, %v1462_v35 }
 0x6b4   :  { %1652 = vpow2.f32 %v1376_v47  ;;  %v1380_v34 = vmul.f32 1.442695, %v1374_v39 }
 0x6b5   :  { %1654 = vpow2.f32 %v1378_v16  ;;  %v1382_v57 = vmul.f32 1.442695, %v1375_v43 }
 0x6b6   :  { %1656 = vpow2.f32 %v1380_v34 }
 0x6b7   :  { %1658 = vpow2.f32 %v1382_v57 }
 0x6be   :  { %v1653_v30 = vpop.eup %1652 }
 0x6bf   :  { %v1655_v38 = vpop.eup %1654  ;;  %v1384_v51 = vmul.f32 %v1653_v30, %v2378_v22 }
 0x6c0   :  { %v1657_v9 = vpop.eup %1656  ;;  %v1385_v13 = vmul.f32 %v1655_v38, %v2380_v26 }
 0x6c1   :  { %v1659_v21 = vpop.eup %1658  ;;  %v1388_v12 = vadd.f32 %v1384_v51, %v1263_v49  ;;  %v1386_v25 = vmul.f32 %v1657_v9, %v2388_v1 }
 0x6c2   :  { %v1389_v61 = vadd.f32 %v1385_v13, %v1265_v31  ;;  %v1387_v8 = vmul.f32 %v1659_v21, %v2390_v3 }
 0x6c3   :  { %1396 = vst [vmem:[#allocation9] sm:$0xff] %v1388_v12  ;;  %v1390_v5 = vadd.f32 %v1386_v25, %v1340_v14 }
 0x6c4   :  { %1397 = vst [vmem:[#allocation9 + $0x8] sm:$0xff] %v1389_v61  ;;  %v1391_v18 = vadd.f32 %v1387_v8, %v1342_v44 }
 0x6c5   :  { %1398 = vst [vmem:[#allocation9 + $0x10] sm:$0xff] %v1390_v5 }
 0x6c6   :  { %1399 = vst [vmem:[#allocation9 + $0x18] sm:$0xff] %v1391_v18 }
 0x6c7   :  { %1791 = shalt.err (!%p1788_p8)
}
 0x6c8   :  { %s1792_s30 = scalar_lea.hbm %s2761_s8, 512 }
 0x6c9   :  { %p1793_p9 = scmp.ne.s32.totalorder %s2761_s8, %s1792_s30  ;;  %p1796_p10 = scmp.lt.u32.totalorder %s1792_s30, %s2761_s8 }
 0x6cb   :  { %p1798_p11 = pnand %p1796_p10, %p1793_p9 }
 0x6cd   :  { %1801 = shalt.err (!%p1798_p11)
}
 0x6ce   :  { %1419 = dma.vmem_to_hbm [thread:$0]  %s1417_s16, 512, %s2761_s8, [#allocation10]  }
 0x6cf   :  { %1806 = dma.done.wait [#allocation4], 512  }
 0x6d0   :  { %1807 = vsyncadd [#allocation4], 4294966784 }
 0x6d1   :  { %1808 = dma.done.wait [#allocation10], 512  }
 0x6d2   :  { %1809 = vsyncadd [#allocation10], 4294966784 }
 0x6d3   :  { %1426 = vsyncpa [#allocation3], 1 }
 0x6d4   :  { %1427 = vsyncpa [#allocation6], 1 }
 0x6d5   :  { %1428 = vsyncpa [#allocation4], 1 }
 0x6d6   :  { %1429 = vsyncpa [#allocation10], 1 }

</bundles_post_ra>
